<compile_context>
chip_gen: v6e
topology: v6e:2x2x1
jax: 0.10.0
libtpu: 0.0.40
codegen_flags: <defaults>
</compile_context>

<pallas_src>
import functools
import math

import jax
import jax.numpy as jnp
import numpy as np
from jax.experimental import pallas as pl
from jax.experimental.pallas import tpu as pltpu


def _round_up(v, m):
    return (v + m - 1) // m * m


# ----------------------------------------------------------------------------
# Pass 1: mean-field Gaussian reparameterization (runs once, whole params)
# ----------------------------------------------------------------------------
def _sample_kernel(wm_ref, lws_ref, wn_ref, bm_ref, lbs_ref, bn_ref,
                   w_ref, b_ref):
    w_ref[...] = wm_ref[...] + jnp.exp(lws_ref[...]) * wn_ref[...]
    b_ref[...] = bm_ref[...] + jnp.exp(lbs_ref[...]) * bn_ref[...]


# ----------------------------------------------------------------------------
# Pass 2: convolution as kh*kw shifted matmuls accumulated in registers
# ----------------------------------------------------------------------------
def _conv_kernel(x_ref, w_ref, b_ref, o_ref, *,
                 kh, kw, stride, dilation, h_out, w_out, cin):
    # x_ref: (1, Hp, Wp, Cin)    zero-padded NHWC image for this batch element
    # w_ref: (kh*kw, Cin, TCO)   sampled weight taps for this Cout block
    # b_ref: (1, TCO)            sampled bias for this Cout block
    # o_ref: (1, Ho*Wo, TCO)     lane-dense output tile
    x = x_ref[0]                                         # (Hp, Wp, Cin)
    m = h_out * w_out
    tco = o_ref.shape[-1]
    acc = jnp.zeros((m, tco), jnp.float32)
    tap = 0
    for i in range(kh):
        for j in range(kw):
            hs = i * dilation
            ws = j * dilation
            # TODO(synk): stride > 1 lowers to a strided static slice; verified
            # for the stride == 1 configuration exercised here.
            window = x[hs:hs + (h_out - 1) * stride + 1:stride,
                       ws:ws + (w_out - 1) * stride + 1:stride, :]  # (Ho,Wo,Cin)
            acc = acc + jnp.dot(window.reshape(m, cin), w_ref[tap],
                                preferred_element_type=jnp.float32)
            tap += 1
    o_ref[0] = (acc + b_ref[...]).astype(o_ref.dtype)


@functools.partial(jax.jit, static_argnames=("stride", "padding", "dilation"))
def mean_field_gaussian_conv2d(x, weights_mean, log_weights_sigma, w_noise,
                               bias_mean, log_bias_sigma, b_noise,
                               *, stride=1, padding=0, dilation=1):
    """Forward of MeanFieldGaussian2DConvolution (groups=1, padding_mode='zeros').

    x:                 (N, Cin, H, W)  NCHW
    weights params:    (Cout, Cin, kh, kw)
    bias params:       (Cout,)
    returns:           (N, Cout, Ho, Wo) NCHW
    """
    # TODO(synk): groups > 1 and non-'zeros' padding modes not implemented.
    n, cin, h, w = x.shape
    cout, cin_w, kh, kw = weights_mean.shape
    assert cin_w == cin, "groups != 1 is not supported"

    itemsize = jnp.dtype(x.dtype).itemsize
    cout_pad = _round_up(cout, 128)            # lane-dense output / weight cols
    k_dim = kh * kw * cin

    # ---- layout glue (cheap, XLA) -------------------------------------------
    # NCHW -> NHWC so channels sit on the lane axis; zero spatial pad.
    x_nhwc = jnp.transpose(x, (0, 2, 3, 1))
    if padding:
        x_nhwc = jnp.pad(
            x_nhwc, ((0, 0), (padding, padding), (padding, padding), (0, 0)))
    hp, wp = h + 2 * padding, w + 2 * padding
    h_out = (hp - dilation * (kh - 1) - 1) // stride + 1
    w_out = (wp - dilation * (kw - 1) - 1) // stride + 1
    m = h_out * w_out

    # Parameters -> tap-major rows ((i, j, c) flattened) x Cout_pad columns.
    # Padded columns: mean=0, log_sigma=0 (exp=1), noise=0 -> sampled value 0.
    def to_kc(p):  # (Cout, Cin, kh, kw) -> (kh*kw*Cin, Cout_pad)
        p = jnp.transpose(p, (2, 3, 1, 0)).reshape(k_dim, cout)
        return jnp.pad(p, ((0, 0), (0, cout_pad - cout)))

    def to_c(p):   # (Cout,) -> (1, Cout_pad)
        return jnp.pad(p.reshape(1, cout), ((0, 0), (0, cout_pad - cout)))

    wm_t, lws_t, wn_t = (to_kc(p) for p in
                         (weights_mean, log_weights_sigma, w_noise))
    bm_2, lbs_2, bn_2 = (to_c(p) for p in
                         (bias_mean, log_bias_sigma, b_noise))

    # ---- pass 1: sample posterior weights / bias once ------------------------
    w_sampled, b_sampled = pl.pallas_call(
        _sample_kernel,
        out_shape=(jax.ShapeDtypeStruct((k_dim, cout_pad), jnp.float32),
                   jax.ShapeDtypeStruct((1, cout_pad), jnp.float32)),
        grid_spec=pltpu.PrefetchScalarGridSpec(
            num_scalar_prefetch=0,
            grid=(1,),
            in_specs=[pl.BlockSpec((k_dim, cout_pad), lambda i: (0, 0))] * 3
                    + [pl.BlockSpec((1, cout_pad), lambda i: (0, 0))] * 3,
            out_specs=(pl.BlockSpec((k_dim, cout_pad), lambda i: (0, 0)),
                       pl.BlockSpec((1, cout_pad), lambda i: (0, 0))),
        ),
    )(wm_t, lws_t, wn_t, bm_2, lbs_2, bn_2)
    w_taps = w_sampled.reshape(kh * kw, cin, cout_pad)   # free reshape

    # ---- pass 2: convolution --------------------------------------------------
    tco = 256 if cout_pad % 256 == 0 else 128            # Cout tile (lane-dense)
    n_co = cout_pad // tco

    kern = functools.partial(_conv_kernel, kh=kh, kw=kw, stride=stride,
                             dilation=dilation, h_out=h_out, w_out=w_out,
                             cin=cin)

    # Explicit VMEM budget with headroom (double-buffered in/out blocks).
    x_blk = hp * wp * cin * itemsize
    w_blk = kh * kw * cin * tco * 4
    o_blk = m * tco * itemsize
    vmem_limit = int(min(max(2 * (x_blk + w_blk + tco * 4 + o_blk) + (8 << 20),
                             16 << 20), 48 << 20))

    cost = pl.CostEstimate(
        flops=2 * n * m * k_dim * cout_pad,
        transcendentals=0,
        bytes_accessed=int(x_nhwc.size * itemsize + w_taps.size * 4
                           + n * m * cout_pad * itemsize))

    out3 = pl.pallas_call(
        kern,
        out_shape=jax.ShapeDtypeStruct((n, m, cout_pad), x.dtype),
        grid_spec=pltpu.PrefetchScalarGridSpec(
            num_scalar_prefetch=0,
            grid=(n, n_co),
            in_specs=[
                pl.BlockSpec((1, hp, wp, cin), lambda b, co: (b, 0, 0, 0)),
                pl.BlockSpec((kh * kw, cin, tco), lambda b, co: (0, 0, co)),
                pl.BlockSpec((1, tco), lambda b, co: (0, co)),
            ],
            out_specs=pl.BlockSpec((1, m, tco), lambda b, co: (b, 0, co)),
        ),
        compiler_params=pltpu.CompilerParams(
            dimension_semantics=("parallel", "parallel"),
            vmem_limit_bytes=vmem_limit),
        cost_estimate=cost,
    )(x_nhwc, w_taps, b_sampled)

    # (N, Ho*Wo, Cout_pad) -> NCHW, dropping the lane padding.
    # TODO(synk): keep NHWC end-to-end if the surrounding model allows, to
    # avoid this final layout transpose.
    out = out3[:, :, :cout].reshape(n, h_out, w_out, cout)
    return jnp.transpose(out, (0, 3, 1, 2))


# ----------------------------------------------------------------------------
# Reference (plain JAX) for verification
# ----------------------------------------------------------------------------
def _reference(x, wm, lws, wn, bm, lbs, bn, stride, padding, dilation):
    w = wm + jnp.exp(lws) * wn
    b = bm + jnp.exp(lbs) * bn
    out = jax.lax.conv_general_dilated(
        x, w,
        window_strides=(stride, stride),
        padding=[(padding, padding), (padding, padding)],
        rhs_dilation=(dilation, dilation),
        dimension_numbers=("NCHW", "OIHW", "NCHW"),
    )
    return out + b.reshape(1, -1, 1, 1)


if __name__ == "__main__":
    # Module config (groups=1, bias=True, padding_mode='zeros')
    in_channels, out_channels = 4, 8
    kernel_size = (3, 3)
    stride, padding, dilation = 1, 1, 1
    init_prior_sigma_scale, w_prior_sigma, b_prior_sigma = 0.01, 1.0, 1.0

    key = jax.random.PRNGKey(0)
    k_x, k_wm, k_bm, k_wn, k_bn = jax.random.split(key, 5)

    # Deterministic parameter init mirroring __init__:
    #   weights_mean = rand(...) - 0.5 ; log_weights_sigma = log(0.01 * sigma_prior)
    w_shape = (out_channels, in_channels, *kernel_size)
    weights_mean = jax.random.uniform(k_wm, w_shape, jnp.float32) - 0.5
    log_weights_sigma = jnp.full(
        w_shape, math.log(init_prior_sigma_scale * w_prior_sigma), jnp.float32)
    bias_mean = jax.random.uniform(k_bm, (out_channels,), jnp.float32) - 0.5
    log_bias_sigma = jnp.full(
        (out_channels,), math.log(init_prior_sigma_scale * b_prior_sigma),
        jnp.float32)

    # Noise samples (sample_transform, stochastic=True)
    w_noise = jax.random.normal(k_wn, w_shape, jnp.float32)
    b_noise = jax.random.normal(k_bn, (out_channels,), jnp.float32)

    # Input NCHW
    x = jax.random.normal(k_x, (2, in_channels, 16, 16), jnp.float32)

    out = mean_field_gaussian_conv2d(
        x, weights_mean, log_weights_sigma, w_noise,
        bias_mean, log_bias_sigma, b_noise,
        stride=stride, padding=padding, dilation=dilation)
    out = jax.block_until_ready(out)

    ref = _reference(x, weights_mean, log_weights_sigma, w_noise,
                     bias_mean, log_bias_sigma, b_noise,
                     stride, padding, dilation)
    np.testing.assert_allclose(np.asarray(out), np.asarray(ref),
                               rtol=1e-4, atol=1e-4)

    print("KERNEL_OK")
</pallas_src>

<mosaic_0001>
module attributes {stable_mosaic.version = 11 : i64} {
  func.func @_sample_kernel(%arg0: i32, %arg1: memref<36x128xf32, #tpu.memory_space<vmem>>, %arg2: memref<36x128xf32, #tpu.memory_space<vmem>>, %arg3: memref<36x128xf32, #tpu.memory_space<vmem>>, %arg4: memref<1x128xf32, #tpu.memory_space<vmem>>, %arg5: memref<1x128xf32, #tpu.memory_space<vmem>>, %arg6: memref<1x128xf32, #tpu.memory_space<vmem>>, %arg7: memref<36x128xf32, #tpu.memory_space<vmem>>, %arg8: memref<1x128xf32, #tpu.memory_space<vmem>>) attributes {dimension_semantics = [#tpu.dimension_semantics<arbitrary>], iteration_bounds = array<i64: 1>, scalar_prefetch = 0 : i64, scratch_operands = 0 : i64, tpu.core_type = #tpu.core_type<tc>, window_params = [{pipeline_mode = #tpu.pipeline_mode<synchronous>, transform_indices = @transform_0, window_bounds = array<i64: 36, 128>}, {pipeline_mode = #tpu.pipeline_mode<synchronous>, transform_indices = @transform_1, window_bounds = array<i64: 36, 128>}, {pipeline_mode = #tpu.pipeline_mode<synchronous>, transform_indices = @transform_2, window_bounds = array<i64: 36, 128>}, {pipeline_mode = #tpu.pipeline_mode<synchronous>, transform_indices = @transform_3, window_bounds = array<i64: 1, 128>}, {pipeline_mode = #tpu.pipeline_mode<synchronous>, transform_indices = @transform_4, window_bounds = array<i64: 1, 128>}, {pipeline_mode = #tpu.pipeline_mode<synchronous>, transform_indices = @transform_5, window_bounds = array<i64: 1, 128>}, {pipeline_mode = #tpu.pipeline_mode<synchronous>, transform_indices = @transform_6, window_bounds = array<i64: 36, 128>}, {pipeline_mode = #tpu.pipeline_mode<synchronous>, transform_indices = @transform_7, window_bounds = array<i64: 1, 128>}]} {
    %c0 = arith.constant 0 : index
    %c0_0 = arith.constant 0 : index
    %0 = vector.load %arg1[%c0, %c0_0] : memref<36x128xf32, #tpu.memory_space<vmem>>, vector<36x128xf32>
    %c0_1 = arith.constant 0 : index
    %c0_2 = arith.constant 0 : index
    %1 = vector.load %arg2[%c0_1, %c0_2] : memref<36x128xf32, #tpu.memory_space<vmem>>, vector<36x128xf32>
    %2 = math.exp %1 : vector<36x128xf32>
    %c0_3 = arith.constant 0 : index
    %c0_4 = arith.constant 0 : index
    %3 = vector.load %arg3[%c0_3, %c0_4] : memref<36x128xf32, #tpu.memory_space<vmem>>, vector<36x128xf32>
    %4 = arith.mulf %2, %3 : vector<36x128xf32>
    %5 = arith.addf %0, %4 : vector<36x128xf32>
    %c0_5 = arith.constant 0 : index
    %c0_6 = arith.constant 0 : index
    %6 = vector.load %arg7[%c0_5, %c0_6] : memref<36x128xf32, #tpu.memory_space<vmem>>, vector<36x128xf32>
    tpu.vector_store %arg7[%c0_5, %c0_6], %5 {strides = array<i32>} : memref<36x128xf32, #tpu.memory_space<vmem>>, vector<36x128xf32>,
    %c0_7 = arith.constant 0 : index
    %c0_8 = arith.constant 0 : index
    %7 = vector.load %arg4[%c0_7, %c0_8] : memref<1x128xf32, #tpu.memory_space<vmem>>, vector<1x128xf32>
    %c0_9 = arith.constant 0 : index
    %c0_10 = arith.constant 0 : index
    %8 = vector.load %arg5[%c0_9, %c0_10] : memref<1x128xf32, #tpu.memory_space<vmem>>, vector<1x128xf32>
    %9 = math.exp %8 : vector<1x128xf32>
    %c0_11 = arith.constant 0 : index
    %c0_12 = arith.constant 0 : index
    %10 = vector.load %arg6[%c0_11, %c0_12] : memref<1x128xf32, #tpu.memory_space<vmem>>, vector<1x128xf32>
    %11 = arith.mulf %9, %10 : vector<1x128xf32>
    %12 = arith.addf %7, %11 : vector<1x128xf32>
    %c0_13 = arith.constant 0 : index
    %c0_14 = arith.constant 0 : index
    %13 = vector.load %arg8[%c0_13, %c0_14] : memref<1x128xf32, #tpu.memory_space<vmem>>, vector<1x128xf32>
    tpu.vector_store %arg8[%c0_13, %c0_14], %12 {strides = array<i32>} : memref<1x128xf32, #tpu.memory_space<vmem>>, vector<1x128xf32>,
    return
  }
  func.func @transform_0(%arg0: i32) -> (i32, i32) {
    %c0_i32 = arith.constant 0 : i32
    %c0_i32_0 = arith.constant 0 : i32
    %c0_i32_1 = arith.constant 0 : i32
    return %c0_i32, %c0_i32_0 : i32, i32
  }
  func.func @transform_1(%arg0: i32) -> (i32, i32) {
    %c0_i32 = arith.constant 0 : i32
    %c0_i32_0 = arith.constant 0 : i32
    %c0_i32_1 = arith.constant 0 : i32
    return %c0_i32, %c0_i32_0 : i32, i32
  }
  func.func @transform_2(%arg0: i32) -> (i32, i32) {
    %c0_i32 = arith.constant 0 : i32
    %c0_i32_0 = arith.constant 0 : i32
    %c0_i32_1 = arith.constant 0 : i32
    return %c0_i32, %c0_i32_0 : i32, i32
  }
  func.func @transform_3(%arg0: i32) -> (i32, i32) {
    %c0_i32 = arith.constant 0 : i32
    %c0_i32_0 = arith.constant 0 : i32
    %c0_i32_1 = arith.constant 0 : i32
    return %c0_i32, %c0_i32_0 : i32, i32
  }
  func.func @transform_4(%arg0: i32) -> (i32, i32) {
    %c0_i32 = arith.constant 0 : i32
    %c0_i32_0 = arith.constant 0 : i32
    %c0_i32_1 = arith.constant 0 : i32
    return %c0_i32, %c0_i32_0 : i32, i32
  }
  func.func @transform_5(%arg0: i32) -> (i32, i32) {
    %c0_i32 = arith.constant 0 : i32
    %c0_i32_0 = arith.constant 0 : i32
    %c0_i32_1 = arith.constant 0 : i32
    return %c0_i32, %c0_i32_0 : i32, i32
  }
  func.func @transform_6(%arg0: i32) -> (i32, i32) {
    %c0_i32 = arith.constant 0 : i32
    %c0_i32_0 = arith.constant 0 : i32
    %c0_i32_1 = arith.constant 0 : i32
    return %c0_i32, %c0_i32_0 : i32, i32
  }
  func.func @transform_7(%arg0: i32) -> (i32, i32) {
    %c0_i32 = arith.constant 0 : i32
    %c0_i32_0 = arith.constant 0 : i32
    %c0_i32_1 = arith.constant 0 : i32
    return %c0_i32, %c0_i32_0 : i32, i32
  }
}

module attributes {stable_mosaic.version = 11 : i64} {
  func.func @_conv_kernel(%arg0: i32, %arg1: i32, %arg2: memref<1x18x18x4xf32, #tpu.memory_space<vmem>>, %arg3: memref<9x4x128xf32, #tpu.memory_space<vmem>>, %arg4: memref<1x128xf32, #tpu.memory_space<vmem>>, %arg5: memref<1x256x128xf32, #tpu.memory_space<vmem>>) attributes {dimension_semantics = [#tpu.dimension_semantics<parallel>, #tpu.dimension_semantics<parallel>], iteration_bounds = array<i64: 2, 1>, scalar_prefetch = 0 : i64, scratch_operands = 0 : i64, tpu.core_type = #tpu.core_type<tc>, window_params = [{transform_indices = @transform_0, window_bounds = array<i64: 1, 18, 18, 4>}, {transform_indices = @transform_1, window_bounds = array<i64: 9, 4, 128>}, {transform_indices = @transform_2, window_bounds = array<i64: 1, 128>}, {transform_indices = @transform_3, window_bounds = array<i64: 1, 256, 128>}]} {
    %c0 = arith.constant 0 : index
    %c0_0 = arith.constant 0 : index
    %c0_1 = arith.constant 0 : index
    %c0_2 = arith.constant 0 : index
    %0 = vector.load %arg2[%c0, %c0_0, %c0_1, %c0_2] : memref<1x18x18x4xf32, #tpu.memory_space<vmem>>, vector<1x18x18x4xf32>
    %1 = vector.shape_cast %0 : vector<1x18x18x4xf32> to vector<18x18x4xf32>
    %cst = arith.constant 0.000000e+00 : f32
    %2 = vector.broadcast %cst : f32 to vector<256x128xf32>
    %3 = vector.extract_strided_slice %1 {offsets = [0, 0, 0], sizes = [16, 16, 4], strides = [1, 1, 1]} : vector<18x18x4xf32> to vector<16x16x4xf32>
    %4 = vector.shape_cast %3 : vector<16x16x4xf32> to vector<256x4xf32>
    %c0_3 = arith.constant 0 : index
    %c0_4 = arith.constant 0 : index
    %c0_5 = arith.constant 0 : index
    %5 = vector.load %arg3[%c0_3, %c0_4, %c0_5] : memref<9x4x128xf32, #tpu.memory_space<vmem>>, vector<1x4x128xf32>
    %6 = vector.shape_cast %5 : vector<1x4x128xf32> to vector<4x128xf32>
    %cst_6 = arith.constant dense<0.000000e+00> : vector<256x128xf32>
    %7 = tpu.matmul %4, %6, %cst_6 {dimension_numbers = #tpu.dot_dimension_numbers<[1], [0], [0], [1], [0, 0, 1, 1], [], []>} : vector<256x4xf32>, vector<4x128xf32>, vector<256x128xf32> -> vector<256x128xf32>
    %8 = arith.addf %2, %7 : vector<256x128xf32>
    %9 = vector.extract_strided_slice %1 {offsets = [0, 1, 0], sizes = [16, 16, 4], strides = [1, 1, 1]} : vector<18x18x4xf32> to vector<16x16x4xf32>
    %10 = vector.shape_cast %9 : vector<16x16x4xf32> to vector<256x4xf32>
    %c1 = arith.constant 1 : index
    %c0_7 = arith.constant 0 : index
    %c0_8 = arith.constant 0 : index
    %11 = vector.load %arg3[%c1, %c0_7, %c0_8] : memref<9x4x128xf32, #tpu.memory_space<vmem>>, vector<1x4x128xf32>
    %12 = vector.shape_cast %11 : vector<1x4x128xf32> to vector<4x128xf32>
    %cst_9 = arith.constant dense<0.000000e+00> : vector<256x128xf32>
    %13 = tpu.matmul %10, %12, %cst_9 {dimension_numbers = #tpu.dot_dimension_numbers<[1], [0], [0], [1], [0, 0, 1, 1], [], []>} : vector<256x4xf32>, vector<4x128xf32>, vector<256x128xf32> -> vector<256x128xf32>
    %14 = arith.addf %8, %13 : vector<256x128xf32>
    %15 = vector.extract_strided_slice %1 {offsets = [0, 2, 0], sizes = [16, 16, 4], strides = [1, 1, 1]} : vector<18x18x4xf32> to vector<16x16x4xf32>
    %16 = vector.shape_cast %15 : vector<16x16x4xf32> to vector<256x4xf32>
    %c2 = arith.constant 2 : index
    %c0_10 = arith.constant 0 : index
    %c0_11 = arith.constant 0 : index
    %17 = vector.load %arg3[%c2, %c0_10, %c0_11] : memref<9x4x128xf32, #tpu.memory_space<vmem>>, vector<1x4x128xf32>
    %18 = vector.shape_cast %17 : vector<1x4x128xf32> to vector<4x128xf32>
    %cst_12 = arith.constant dense<0.000000e+00> : vector<256x128xf32>
    %19 = tpu.matmul %16, %18, %cst_12 {dimension_numbers = #tpu.dot_dimension_numbers<[1], [0], [0], [1], [0, 0, 1, 1], [], []>} : vector<256x4xf32>, vector<4x128xf32>, vector<256x128xf32> -> vector<256x128xf32>
    %20 = arith.addf %14, %19 : vector<256x128xf32>
    %21 = vector.extract_strided_slice %1 {offsets = [1, 0, 0], sizes = [16, 16, 4], strides = [1, 1, 1]} : vector<18x18x4xf32> to vector<16x16x4xf32>
    %22 = vector.shape_cast %21 : vector<16x16x4xf32> to vector<256x4xf32>
    %c3 = arith.constant 3 : index
    %c0_13 = arith.constant 0 : index
    %c0_14 = arith.constant 0 : index
    %23 = vector.load %arg3[%c3, %c0_13, %c0_14] : memref<9x4x128xf32, #tpu.memory_space<vmem>>, vector<1x4x128xf32>
    %24 = vector.shape_cast %23 : vector<1x4x128xf32> to vector<4x128xf32>
    %cst_15 = arith.constant dense<0.000000e+00> : vector<256x128xf32>
    %25 = tpu.matmul %22, %24, %cst_15 {dimension_numbers = #tpu.dot_dimension_numbers<[1], [0], [0], [1], [0, 0, 1, 1], [], []>} : vector<256x4xf32>, vector<4x128xf32>, vector<256x128xf32> -> vector<256x128xf32>
    %26 = arith.addf %20, %25 : vector<256x128xf32>
    %27 = vector.extract_strided_slice %1 {offsets = [1, 1, 0], sizes = [16, 16, 4], strides = [1, 1, 1]} : vector<18x18x4xf32> to vector<16x16x4xf32>
    %28 = vector.shape_cast %27 : vector<16x16x4xf32> to vector<256x4xf32>
    %c4 = arith.constant 4 : index
    %c0_16 = arith.constant 0 : index
    %c0_17 = arith.constant 0 : index
    %29 = vector.load %arg3[%c4, %c0_16, %c0_17] : memref<9x4x128xf32, #tpu.memory_space<vmem>>, vector<1x4x128xf32>
    %30 = vector.shape_cast %29 : vector<1x4x128xf32> to vector<4x128xf32>
    %cst_18 = arith.constant dense<0.000000e+00> : vector<256x128xf32>
    %31 = tpu.matmul %28, %30, %cst_18 {dimension_numbers = #tpu.dot_dimension_numbers<[1], [0], [0], [1], [0, 0, 1, 1], [], []>} : vector<256x4xf32>, vector<4x128xf32>, vector<256x128xf32> -> vector<256x128xf32>
    %32 = arith.addf %26, %31 : vector<256x128xf32>
    %33 = vector.extract_strided_slice %1 {offsets = [1, 2, 0], sizes = [16, 16, 4], strides = [1, 1, 1]} : vector<18x18x4xf32> to vector<16x16x4xf32>
    %34 = vector.shape_cast %33 : vector<16x16x4xf32> to vector<256x4xf32>
    %c5 = arith.constant 5 : index
    %c0_19 = arith.constant 0 : index
    %c0_20 = arith.constant 0 : index
    %35 = vector.load %arg3[%c5, %c0_19, %c0_20] : memref<9x4x128xf32, #tpu.memory_space<vmem>>, vector<1x4x128xf32>
    %36 = vector.shape_cast %35 : vector<1x4x128xf32> to vector<4x128xf32>
    %cst_21 = arith.constant dense<0.000000e+00> : vector<256x128xf32>
    %37 = tpu.matmul %34, %36, %cst_21 {dimension_numbers = #tpu.dot_dimension_numbers<[1], [0], [0], [1], [0, 0, 1, 1], [], []>} : vector<256x4xf32>, vector<4x128xf32>, vector<256x128xf32> -> vector<256x128xf32>
    %38 = arith.addf %32, %37 : vector<256x128xf32>
    %39 = vector.extract_strided_slice %1 {offsets = [2, 0, 0], sizes = [16, 16, 4], strides = [1, 1, 1]} : vector<18x18x4xf32> to vector<16x16x4xf32>
    %40 = vector.shape_cast %39 : vector<16x16x4xf32> to vector<256x4xf32>
    %c6 = arith.constant 6 : index
    %c0_22 = arith.constant 0 : index
    %c0_23 = arith.constant 0 : index
    %41 = vector.load %arg3[%c6, %c0_22, %c0_23] : memref<9x4x128xf32, #tpu.memory_space<vmem>>, vector<1x4x128xf32>
    %42 = vector.shape_cast %41 : vector<1x4x128xf32> to vector<4x128xf32>
    %cst_24 = arith.constant dense<0.000000e+00> : vector<256x128xf32>
    %43 = tpu.matmul %40, %42, %cst_24 {dimension_numbers = #tpu.dot_dimension_numbers<[1], [0], [0], [1], [0, 0, 1, 1], [], []>} : vector<256x4xf32>, vector<4x128xf32>, vector<256x128xf32> -> vector<256x128xf32>
    %44 = arith.addf %38, %43 : vector<256x128xf32>
    %45 = vector.extract_strided_slice %1 {offsets = [2, 1, 0], sizes = [16, 16, 4], strides = [1, 1, 1]} : vector<18x18x4xf32> to vector<16x16x4xf32>
    %46 = vector.shape_cast %45 : vector<16x16x4xf32> to vector<256x4xf32>
    %c7 = arith.constant 7 : index
    %c0_25 = arith.constant 0 : index
    %c0_26 = arith.constant 0 : index
    %47 = vector.load %arg3[%c7, %c0_25, %c0_26] : memref<9x4x128xf32, #tpu.memory_space<vmem>>, vector<1x4x128xf32>
    %48 = vector.shape_cast %47 : vector<1x4x128xf32> to vector<4x128xf32>
    %cst_27 = arith.constant dense<0.000000e+00> : vector<256x128xf32>
    %49 = tpu.matmul %46, %48, %cst_27 {dimension_numbers = #tpu.dot_dimension_numbers<[1], [0], [0], [1], [0, 0, 1, 1], [], []>} : vector<256x4xf32>, vector<4x128xf32>, vector<256x128xf32> -> vector<256x128xf32>
    %50 = arith.addf %44, %49 : vector<256x128xf32>
    %51 = vector.extract_strided_slice %1 {offsets = [2, 2, 0], sizes = [16, 16, 4], strides = [1, 1, 1]} : vector<18x18x4xf32> to vector<16x16x4xf32>
    %52 = vector.shape_cast %51 : vector<16x16x4xf32> to vector<256x4xf32>
    %c8 = arith.constant 8 : index
    %c0_28 = arith.constant 0 : index
    %c0_29 = arith.constant 0 : index
    %53 = vector.load %arg3[%c8, %c0_28, %c0_29] : memref<9x4x128xf32, #tpu.memory_space<vmem>>, vector<1x4x128xf32>
    %54 = vector.shape_cast %53 : vector<1x4x128xf32> to vector<4x128xf32>
    %cst_30 = arith.constant dense<0.000000e+00> : vector<256x128xf32>
    %55 = tpu.matmul %52, %54, %cst_30 {dimension_numbers = #tpu.dot_dimension_numbers<[1], [0], [0], [1], [0, 0, 1, 1], [], []>} : vector<256x4xf32>, vector<4x128xf32>, vector<256x128xf32> -> vector<256x128xf32>
    %56 = arith.addf %50, %55 : vector<256x128xf32>
    %c0_31 = arith.constant 0 : index
    %c0_32 = arith.constant 0 : index
    %57 = vector.load %arg4[%c0_31, %c0_32] : memref<1x128xf32, #tpu.memory_space<vmem>>, vector<1x128xf32>
    %58 = vector.broadcast %57 : vector<1x128xf32> to vector<256x128xf32>
    %59 = arith.addf %56, %58 : vector<256x128xf32>
    %c0_33 = arith.constant 0 : index
    %c0_34 = arith.constant 0 : index
    %c0_35 = arith.constant 0 : index
    %60 = vector.load %arg5[%c0_33, %c0_34, %c0_35] : memref<1x256x128xf32, #tpu.memory_space<vmem>>, vector<1x256x128xf32>
    %61 = vector.shape_cast %60 : vector<1x256x128xf32> to vector<256x128xf32>
    %62 = vector.shape_cast %59 : vector<256x128xf32> to vector<1x256x128xf32>
    tpu.vector_store %arg5[%c0_33, %c0_34, %c0_35], %62 {strides = array<i32>} : memref<1x256x128xf32, #tpu.memory_space<vmem>>, vector<1x256x128xf32>,
    return
  }
  func.func @transform_0(%arg0: i32, %arg1: i32) -> (i32, i32, i32, i32) {
    %c0_i32 = arith.constant 0 : i32
    %c0_i32_0 = arith.constant 0 : i32
    %c0_i32_1 = arith.constant 0 : i32
    %c0_i32_2 = arith.constant 0 : i32
    return %arg0, %c0_i32, %c0_i32_0, %c0_i32_1 : i32, i32, i32, i32
  }
  func.func @transform_1(%arg0: i32, %arg1: i32) -> (i32, i32, i32) {
    %c0_i32 = arith.constant 0 : i32
    %c0_i32_0 = arith.constant 0 : i32
    %c0_i32_1 = arith.constant 0 : i32
    return %c0_i32, %c0_i32_0, %arg1 : i32, i32, i32
  }
  func.func @transform_2(%arg0: i32, %arg1: i32) -> (i32, i32) {
    %c0_i32 = arith.constant 0 : i32
    %c0_i32_0 = arith.constant 0 : i32
    return %c0_i32, %arg1 : i32, i32
  }
  func.func @transform_3(%arg0: i32, %arg1: i32) -> (i32, i32, i32) {
    %c0_i32 = arith.constant 0 : i32
    %c0_i32_0 = arith.constant 0 : i32
    return %arg0, %c0_i32, %arg1 : i32, i32, i32
  }
}

</mosaic_0001>

<bundles_post_ra>
// kernel: mean_field_gaussian_conv2d.2
= control target key start
LH: loop header
LB: loop body
LE: loop exit
PB: predicated region body
PF: predicated region fallthrough
CT: control target
= control target key end

     0   :  { %s205_s1 = inlined_call_operand.vmem [shape: f32[36,128], index: 1, kind: input, shape index: {}]   ;;  %s206_s4 = inlined_call_operand.vmem [shape: f32[1,128], index: 4, kind: input, shape index: {}]   ;;  %s207_s2 = inlined_call_operand.vmem [shape: f32[36,128], index: 2, kind: input, shape index: {}]   ;;  %s208_s0 = inlined_call_operand.vmem [shape: f32[36,128], index: 0, kind: input, shape index: {}]   ;;  %s209_s5 = inlined_call_operand.vmem [shape: f32[1,128], index: 5, kind: input, shape index: {}]   ;;  %s210_s6 = inlined_call_operand.vmem [shape: f32[36,128], index: 6, kind: output, shape index: {0}]   ;;  %s211_s3 = inlined_call_operand.vmem [shape: f32[1,128], index: 3, kind: input, shape index: {}]   ;;  %s212_s7 = inlined_call_operand.vmem [shape: f32[1,128], index: 7, kind: output, shape index: {1}]  }
   0x1   :  { %v30_v0 = vld [vmem:[%s205_s1] sm:$0xff]  ;;  %v31_v2 = vld [vmem:[%s205_s1 + $0x8] sm:$0xff]  ;;  %v32_v4 = vld [vmem:[%s205_s1 + $0x10] sm:$0xff] }
   0x2   :  { %v35_v1 = vmul.f32 1.442695, %v30_v0  ;;  %v37_v3 = vmul.f32 1.442695, %v31_v2  ;;  %v39_v5 = vmul.f32 1.442695, %v32_v4 }
   0x3   :  { %v33_v6 = vld [vmem:[%s205_s1 + $0x18] sm:$0xff]  ;;  %v34_v8 = vld [vmem:[%s205_s1 + $0x20] sm:$0xf]  ;;  %v46_v13 = vld [vmem:[%s207_s2 + $0x8] sm:$0xff] }
   0x4   :  { %81 = vpow2.f32 %v35_v1  ;;  %v41_v7 = vmul.f32 1.442695, %v33_v6  ;;  %v43_v9 = vmul.f32 1.442695, %v34_v8  ;;  %v66_v10 = vld [vmem:[%s206_s4] sm:$0x1] }
   0x5   :  { %83 = vpow2.f32 %v37_v3  ;;  %v67_v11 = vmul.f32 1.442695, %v66_v10  ;;  %v45_v12 = vld [vmem:[%s207_s2] sm:$0xff]  ;;  %v47_v16 = vld [vmem:[%s207_s2 + $0x10] sm:$0xff]  ;;  %v26_v19 = vld [vmem:[%s208_s0 + $0x8] sm:$0xff] }
   0x6   :  { %85 = vpow2.f32 %v39_v5  ;;  %v25_v15 = vld [vmem:[%s208_s0] sm:$0xff]  ;;  %v48_v20 = vld [vmem:[%s207_s2 + $0x18] sm:$0xff]  ;;  %v27_v23 = vld [vmem:[%s208_s0 + $0x10] sm:$0xff] }
   0x7   :  { %87 = vpow2.f32 %v41_v7  ;;  %v49_v24 = vld [vmem:[%s207_s2 + $0x20] sm:$0xf]  ;;  %v28_v28 = vld [vmem:[%s208_s0 + $0x18] sm:$0xff] }
   0x8   :  { %89 = vpow2.f32 %v43_v9  ;;  %v29_v32 = vld [vmem:[%s208_s0 + $0x20] sm:$0xf] }
   0x9   :  { %91 = vpow2.f32 %v67_v11  ;;  %v69_v33 = vld [vmem:[%s209_s5] sm:$0x1] }
   0xa   :  { %v65_v38 = vld [vmem:[%s211_s3] sm:$0x1] }
  0x11   :  { %v82_v14 = vpop.eup %81 }
  0x12   :  { %v84_v17 = vpop.eup %83  ;;  %v50_v18 = vmul.f32 %v82_v14, %v45_v12 }
  0x13   :  { %v86_v21 = vpop.eup %85  ;;  %v51_v22 = vmul.f32 %v84_v17, %v46_v13 }
  0x14   :  { %v88_v25 = vpop.eup %87  ;;  %v55_v26 = vadd.f32 %v50_v18, %v25_v15  ;;  %v52_v27 = vmul.f32 %v86_v21, %v47_v16 }
  0x15   :  { %v90_v29 = vpop.eup %89  ;;  %v56_v30 = vadd.f32 %v51_v22, %v26_v19  ;;  %v53_v31 = vmul.f32 %v88_v25, %v48_v20 }
  0x16   :  { %60 = vst [vmem:[%s210_s6] sm:$0xff] %v55_v26  ;;  %v57_v34 = vadd.f32 %v52_v27, %v27_v23  ;;  %v54_v35 = vmul.f32 %v90_v29, %v49_v24  ;;  %v92_v36 = vpop.eup %91 }
  0x17   :  { %61 = vst [vmem:[%s210_s6 + $0x8] sm:$0xff] %v56_v30  ;;  %v58_v37 = vadd.f32 %v53_v31, %v28_v28  ;;  %v70_v40 = vmul.f32 %v92_v36, %v69_v33 }
  0x18   :  { %62 = vst [vmem:[%s210_s6 + $0x10] sm:$0xff] %v57_v34  ;;  %v59_v39 = vadd.f32 %v54_v35, %v29_v32 }
  0x19   :  { %63 = vst [vmem:[%s210_s6 + $0x18] sm:$0xff] %v58_v37  ;;  %v71_v41 = vadd.f32 %v70_v40, %v65_v38 }
  0x1a   :  { %64 = vst [vmem:[%s210_s6 + $0x20] sm:$0xf] %v59_v39 }
  0x1b   :  { %72 = vst [vmem:[%s212_s7] sm:$0x1] %v71_v41 }

// kernel: mean_field_gaussian_conv2d.3
= control target key start
LH: loop header
LB: loop body
LE: loop exit
PB: predicated region body
PF: predicated region fallthrough
CT: control target
= control target key end

     0   :  { %s4336_s12 = smov 0   ;;  %s4338_s13 = smov 0   ;;  %s6022_s0 = inlined_call_operand.vmem [shape: f32[2,18,18,4], index: 0, kind: input, shape index: {}]   ;;  %s6023_s1 = inlined_call_operand.vmem [shape: f32[9,4,128], index: 1, kind: input, shape index: {}]   ;;  %s6024_s2 = inlined_call_operand.vmem [shape: f32[1,128], index: 2, kind: input, shape index: {}]   ;;  %s6025_s3 = inlined_call_operand.vmem [shape: f32[2,256,128], index: 3, kind: output, shape index: {}]  }
   0x1   :  { %s4340_s14 = smov 0  }
   0x2 LB: > { %s25_s15 = sadd.s32 1, %s4310_s13  ;;  %p3205_p0 = scmp.ge.s32.totalorder %s4314_s14, 1  ;;  %s4314_s14 = sphi %s4340_s14, %s13_s14   ;;  %s4310_s13 = sphi %s4338_s13, %s6317_s13   ;;  %s4306_s12 = sphi %s4336_s12, %s6316_s12  }
   0x3   : > { %p27_p1 = scmp.ge.s32.totalorder %s25_s15, 2  ;;  %p168_p2 = scmp.lt.s32.totalorder %s4314_s14, 3 }
   0x5   : > { %s6319_s15 = smov (%p27_p1, %s25_s15), 0  ;;  %p169_p3 = pnand %p3205_p0, %p168_p2 }
   0x7   : > { %172 = sbr.rel (%p169_p3) target bundleno = 510 (0x1fe), region = 32 }
   0xc   : > { %v3209_v0 = vld [vmem:[%s6023_s1 + $0x4] sm:$0xf]  ;;  %vm473_vm0 = vcmask 1043456   ;;  %p202_p4 = scmp.lt.s32.totalorder %s4306_s12, 1  ;;  %v276_v1 = vld [vmem:[%s6023_s1] sm:$0xf] }
   0xd   : > { %4265 = vmatprep.subr.msk.mxu1 %vm473_vm0, %v3209_v0  ;;  %3815 = vmatprep.subr.msk.mxu0 %vm473_vm0, %v3209_v0  ;;  %v3276_v2 = vld [vmem:[%s6023_s1 + $0x8] sm:$0xf]  ;;  %vm325_vm1 = vcmask 1046528   ;;  %vm408_vm2 = vcmask 31744   ;;  %v4418_v21 = vld [vmem:[%s6023_s1 + $0xc] sm:$0xf] }
   0xe   : > { %4266 = vmatpush3.msk.msra.mxu1 %vm473_vm0, %v3209_v0  ;;  %3816 = vmatpush3.msk.msra.mxu0 %vm473_vm0, %v3209_v0  ;;  %s6321_s12 = smov (!%p202_p4, %s4306_s12), 1  ;;  %v4436_v28 = vld [vmem:[%s6023_s1 + $0x10] sm:$0xf]  ;;  %vm994_vm3 = vcmask 1045504  }
   0xf   : > { %3865 = vmatprep.subr.msk.mxu1 %vm473_vm0, %v276_v1  ;;  %3915 = vmatprep.subr.msk.mxu0 %vm473_vm0, %v3276_v2  ;;  %s4267_s22 = smul.u32 432, %s6321_s12  ;;  %s3517_s11 = sshll.u32 %s6321_s12, 8 }
  0x10   : > { %s5866_s19 = scalar_lea.vmem %s6025_s3, %s3517_s11 }
  0x11   : > { %s4375_s25 = scalar_lea.vmem %s6022_s0, %s4267_s22 }
  0x12   : > { %v4378_v3 = vld [vmem:[%s4375_s25] sm:$0xff]  ;;  %v4381_v4 = vld [vmem:[%s4375_s25 + $0x8] sm:$0xff]  ;;  %v4393_v10 = vld [vmem:[%s4375_s25 + $0x10] sm:$0x3] }
  0x13   : > { %v4384_v5 = vld [vmem:[%s4375_s25 + $0xc0] sm:$0xff]  ;;  %v326_v6 = vrot.slane %v4378_v3, 1  ;;  %v327_v7 = vrot.slane %v4381_v4, 1  ;;  %v4389_v8 = vld [vmem:[%s4375_s25 + $0xc8] sm:$0xff]  ;;  %v329_v12 = vrot.slane %v4393_v10, 1  ;;  %v4401_v14 = vld [vmem:[%s4375_s25 + $0x18] sm:$0xff] }
  0x14   : > { %v366_v9 = vrot.slane %v4384_v5, 1  ;;  %v367_v11 = vrot.slane %v4389_v8, 1  ;;  %v4398_v13 = vld [vmem:[%s4375_s25 + $0xd0] sm:$0x3]  ;;  %v4406_v17 = vld [vmem:[%s4375_s25 + $0x20] sm:$0xff]  ;;  %v331_v18 = vrot.slane %v4401_v14, 1 }
  0x15   : > { %v328_v15 = vsel %vm325_vm1, %v326_v6, %v327_v7  ;;  %v369_v16 = vrot.slane %v4398_v13, 1  ;;  %v4410_v19 = vld [vmem:[%s4375_s25 + $0xd8] sm:$0xff]  ;;  %v4413_v20 = vld [vmem:[%s4375_s25 + $0xe0] sm:$0xff]  ;;  %v330_v23 = vsel %vm325_vm1, %v327_v7, %v329_v12  ;;  %v332_v24 = vrot.slane %v4406_v17, 1  ;;  %v4428_v26 = vld [vmem:[%s4375_s25 + $0x28] sm:$0x3] }
  0x16   : > { %3817 = vmatprep.mubr.msk.f32.mxu0 %vm408_vm2, %v328_v15  ;;  %v4422_v22 = vsel %vm325_vm1, %v366_v9, %v367_v11  ;;  %v371_v25 = vrot.slane %v4410_v19, 1  ;;  %v4431_v27 = vld [vmem:[%s4375_s25 + $0xe8] sm:$0x3]  ;;  %v372_v30 = vrot.slane %v4413_v20, 1  ;;  %v334_v31 = vrot.slane %v4428_v26, 1  ;;  %v4448_v33 = vld [vmem:[%s4375_s25 + $0x30] sm:$0xff] }
  0x17   : > { %6108 = vst [vmem:[#allocation2_spill] sm:$0xff] %v4422_v22  ;;  %3841 = vmatprep.mubr.msk.f32.mxu1 %vm408_vm2, %v4422_v22  ;;  %3818 = vmatmul.mubr.msk.f32.vlgmr.msra.gmra.mxu0 %vm408_vm2, %v330_v23  ;;  %v4442_v29 = vsel %vm325_vm1, %v367_v11, %v369_v16  ;;  %v374_v32 = vrot.slane %v4431_v27, 1  ;;  %v4451_v34 = vld [vmem:[%s4375_s25 + $0x38] sm:$0xff]  ;;  %v4454_v35 = vld [vmem:[%s4375_s25 + $0xf0] sm:$0xff]  ;;  %v4460_v36 = vsel %vm325_vm1, %v331_v18, %v332_v24  ;;  %v336_v37 = vrot.slane %v4448_v33, 1  ;;  %v4488_v47 = vld [vmem:[%s4375_s25 + $0x48] sm:$0xff] }
  0x18   : > { %6109 = vst [vmem:[#allocation3_spill] sm:$0xff] %v4442_v29  ;;  %3842 = vmatmul.mubr.msk.f32.vlgmr.msra.gmra.mxu1 %vm408_vm2, %v4442_v29  ;;  %3916 = vmatpush3.msk.msra.mxu0 %vm473_vm0, %v3276_v2  ;;  %6110 = vst [vmem:[#allocation4_spill] sm:$0xff] %v4460_v36  ;;  %v337_v38 = vrot.slane %v4451_v34, 1  ;;  %v4465_v39 = vld [vmem:[%s4375_s25 + $0xf8] sm:$0xff]  ;;  %v376_v40 = vrot.slane %v4454_v35, 1  ;;  %v4475_v42 = vsel %vm325_vm1, %v371_v25, %v372_v30  ;;  %v4491_v48 = vld [vmem:[%s4375_s25 + $0x50] sm:$0xff] }
  0x19   : > { %v4469_v41 = vld [vmem:[%s4375_s25 + $0x40] sm:$0x3]  ;;  %3866 = vmatpush3.msk.msra.mxu1 %vm473_vm0, %v276_v1  ;;  %3820 = vmatprep.mubr.msk.f32.mxu0 %vm408_vm2, %v4460_v36  ;;  %6111 = vst [vmem:[#allocation5_spill] sm:$0xff] %v4475_v42  ;;  %v4478_v43 = vsel %vm325_vm1, %v332_v24, %v334_v31  ;;  %v4481_v44 = vsel %vm325_vm1, %v372_v30, %v374_v32  ;;  %v377_v45 = vrot.slane %v4465_v39, 1  ;;  %v341_v52 = vrot.slane %v4488_v47, 1  ;;  %v4502_v53 = vld [vmem:[%s4375_s25 + $0x108] sm:$0xff] }
  0x1a   : > { %6112 = vst [vmem:[#allocation6_spill] sm:$0xff] %v4478_v43  ;;  %6113 = vst [vmem:[#allocation7_spill] sm:$0xff] %v4481_v44  ;;  %v4485_v46 = vld [vmem:[%s4375_s25 + $0x100] sm:$0x3]  ;;  %3844 = vmatprep.mubr.msk.f32.mxu1 %vm408_vm2, %v4475_v42  ;;  %v4496_v49 = vsel %vm325_vm1, %v336_v37, %v337_v38  ;;  %v339_v50 = vrot.slane %v4469_v41, 1  ;;  %v4505_v54 = vld [vmem:[%s4375_s25 + $0x110] sm:$0xff]  ;;  %3965 = vmatprep.subr.msk.mxu1 %vm473_vm0, %v4418_v21 }
  0x1b   : > { %6114 = vst [vmem:[#allocation8_spill] sm:$0xff] %v4496_v49  ;;  %v379_v51 = vrot.slane %v4485_v46, 1  ;;  %v4508_v55 = vld [vmem:[%s4375_s25 + $0x60] sm:$0xff]  ;;  %3821 = vmatmul.mubr.msk.f32.gmra.mxu0 %vm408_vm2, %v4478_v43  ;;  %v4515_v56 = vsel %vm325_vm1, %v376_v40, %v377_v45  ;;  %v342_v57 = vrot.slane %v4491_v48, 1  ;;  %v381_v58 = vrot.slane %v4502_v53, 1  ;;  %v4524_v61 = vld [vmem:[%s4375_s25 + $0x68] sm:$0xff]  ;;  %4015 = vmatprep.subr.msk.mxu0 %vm473_vm0, %v4436_v28 }
  0x1c   : > { %6115 = vst [vmem:[#allocation9_spill] sm:$0xff] %v4515_v56  ;;  %v382_v59 = vrot.slane %v4505_v54, 1  ;;  %v4521_v60 = vld [vmem:[%s4375_s25 + $0x58] sm:$0x3]  ;;  %3845 = vmatmul.mubr.msk.f32.gmra.mxu1 %vm408_vm2, %v4481_v44  ;;  %3823 = vmatprep.mubr.msk.f32.mxu0 %vm408_vm2, %v4496_v49  ;;  %v4533_v62 = vsel %vm325_vm1, %v337_v38, %v339_v50  ;;  %v346_v1 = vrot.slane %v4508_v55, 1  ;;  %v4541_v2 = vld [vmem:[%s4375_s25 + $0x120] sm:$0xff] }
  0x1d   : > { %6116 = vst [vmem:[#allocation10_spill] sm:$0xff] %v4533_v62  ;;  %v344_v63 = vrot.slane %v4521_v60, 1  ;;  %v4537_v0 = vld [vmem:[%s4375_s25 + $0x118] sm:$0x3]  ;;  %v4544_v6 = vld [vmem:[%s4375_s25 + $0x128] sm:$0xff]  ;;  %3847 = vmatprep.mubr.msk.f32.mxu1 %vm408_vm2, %v4515_v56  ;;  %v4549_v7 = vsel %vm325_vm1, %v377_v45, %v379_v51  ;;  %v4552_v9 = vsel %vm325_vm1, %v341_v52, %v342_v57  ;;  %v347_v12 = vrot.slane %v4524_v61, 1 }
  0x1e   : > { %6117 = vst [vmem:[#allocation11_spill] sm:$0xff] %v4549_v7  ;;  %6118 = vst [vmem:[#allocation12_spill] sm:$0xff] %v4552_v9  ;;  %v384_v11 = vrot.slane %v4537_v0, 1  ;;  %v4557_v15 = vld [vmem:[%s4375_s25 + $0x70] sm:$0x3]  ;;  %v4563_v18 = vsel %vm325_vm1, %v381_v58, %v382_v59  ;;  %v386_v23 = vrot.slane %v4541_v2, 1 }
  0x1f   : > { %v4560_v16 = vld [vmem:[%s4375_s25 + $0x130] sm:$0x3]  ;;  %6119 = vst [vmem:[#allocation13_spill] sm:$0xff] %v4563_v18  ;;  %v387_v24 = vrot.slane %v4544_v6, 1  ;;  %v4568_v25 = vld [vmem:[%s4375_s25 + $0x78] sm:$0xff]  ;;  %v4571_v30 = vld [vmem:[%s4375_s25 + $0x80] sm:$0xff]  ;;  %3824 = vmatmul.mubr.msk.f32.gmra.mxu0 %vm408_vm2, %v4533_v62  ;;  %v4586_v37 = vsel %vm325_vm1, %v342_v57, %v344_v63  ;;  %v4596_v50 = vsel %vm325_vm1, %v346_v1, %v347_v12 }
  0x20   : > { %v4576_v31 = vld [vmem:[%s4375_s25 + $0x138] sm:$0xff]  ;;  %v4579_v32 = vld [vmem:[%s4375_s25 + $0x140] sm:$0xff]  ;;  %3848 = vmatmul.mubr.msk.f32.gmra.mxu1 %vm408_vm2, %v4549_v7  ;;  %3826 = vmatprep.mubr.msk.f32.mxu0 %vm408_vm2, %v4552_v9  ;;  %6120 = vst [vmem:[#allocation14_spill] sm:$0xff] %v4586_v37  ;;  %v349_v38 = vrot.slane %v4557_v15, 1  ;;  %v389_v40 = vrot.slane %v4560_v16, 1  ;;  %v4593_v45 = vsel %vm325_vm1, %v382_v59, %v384_v11  ;;  %6122 = vst [vmem:[#allocation16_spill] sm:$0xff] %v4596_v50 }
  0x21   : > { %3850 = vmatprep.mubr.msk.f32.mxu1 %vm408_vm2, %v4563_v18  ;;  %6121 = vst [vmem:[#allocation15_spill] sm:$0xff] %v4593_v45  ;;  %v351_v51 = vrot.slane %v4568_v25, 1  ;;  %v352_v52 = vrot.slane %v4571_v30, 1  ;;  %v4601_v57 = vld [vmem:[%s4375_s25 + $0x88] sm:$0x3]  ;;  %v4607_v63 = vsel %vm325_vm1, %v386_v23, %v387_v24  ;;  %v391_v7 = vrot.slane %v4576_v31, 1 }
  0x22   : > { %v4604_v58 = vld [vmem:[%s4375_s25 + $0x148] sm:$0x3]  ;;  %6123 = vst [vmem:[#allocation17_spill] sm:$0xff] %v4607_v63  ;;  %v392_v18 = vrot.slane %v4579_v32, 1  ;;  %v4612_v59 = vld [vmem:[%s4375_s25 + $0x90] sm:$0xff]  ;;  %v4615_v1 = vld [vmem:[%s4375_s25 + $0x98] sm:$0xff]  ;;  %v4630_v23 = vsel %vm325_vm1, %v347_v12, %v349_v38  ;;  %v4637_v29 = vsel %vm325_vm1, %v387_v24, %v389_v40 }
  0x23   : > { %3827 = vmatmul.mubr.msk.f32.gmra.mxu0 %vm408_vm2, %v4586_v37  ;;  %v4620_v11 = vld [vmem:[%s4375_s25 + $0x150] sm:$0xff]  ;;  %v4623_v56 = vld [vmem:[%s4375_s25 + $0x158] sm:$0xff]  ;;  %6125 = vst [vmem:[#allocation19_spill] sm:$0xff] %v4630_v23  ;;  %v354_v44 = vrot.slane %v4601_v57, 1  ;;  %v394_v42 = vrot.slane %v4604_v58, 1  ;;  %6126 = vst [vmem:[#allocation20_spill] sm:$0xff] %v4637_v29 }
  0x24   : > { %6124 = vst [vmem:[#allocation18_spill] sm:$0xff] %v4623_v56  ;;  %3851 = vmatmul.mubr.msk.f32.gmra.mxu1 %vm408_vm2, %v4593_v45  ;;  %3829 = vmatprep.mubr.msk.f32.mxu0 %vm408_vm2, %v4596_v50  ;;  %v4640_v45 = vsel %vm325_vm1, %v351_v51, %v352_v52  ;;  %v356_v22 = vrot.slane %v4612_v59, 1  ;;  %v357_v12 = vrot.slane %v4615_v1, 1  ;;  %v4645_v38 = vld [vmem:[%s4375_s25 + $0xa0] sm:$0x3]  ;;  %v4648_v50 = vsel %vm325_vm1, %v391_v7, %v392_v18  ;;  %v4656_v24 = vld [vmem:[%s4375_s25 + $0xa8] sm:$0xff] }
  0x25   : > { %3853 = vmatprep.mubr.msk.f32.mxu1 %vm408_vm2, %v4607_v63  ;;  %6127 = vst [vmem:[#allocation21_spill] sm:$0xff] %v4640_v45  ;;  %6128 = vst [vmem:[#allocation22_spill] sm:$0xff] %v4648_v50  ;;  %v396_v37 = vrot.slane %v4620_v11, 1  ;;  %v397_v9 = vrot.slane %v4623_v56, 1  ;;  %v4653_v63 = vld [vmem:[%s4375_s25 + $0x160] sm:$0x3]  ;;  %v4674_v7 = vsel %vm325_vm1, %v352_v52, %v354_v44  ;;  %v4677_v49 = vsel %vm325_vm1, %v392_v18, %v394_v42 }
  0x26   : > { %v4659_v40 = vld [vmem:[%s4375_s25 + $0xb0] sm:$0xff]  ;;  %v4664_v51 = vld [vmem:[%s4375_s25 + $0x168] sm:$0xff]  ;;  %6130 = vst [vmem:[#allocation24_spill] sm:$0xff] %v4674_v7  ;;  %6131 = vst [vmem:[#allocation25_spill] sm:$0xff] %v4677_v49  ;;  %v359_v43 = vrot.slane %v4645_v38, 1  ;;  %v399_v36 = vrot.slane %v4653_v63, 1 }
  0x27   : > { %3830 = vmatmul.mubr.msk.f32.gmra.mxu0 %vm408_vm2, %v4630_v23  ;;  %v4667_v62 = vld [vmem:[%s4375_s25 + $0x170] sm:$0xff]  ;;  %v4683_v23 = vsel %vm325_vm1, %v356_v22, %v357_v12  ;;  %v4689_v56 = vld [vmem:[%s4375_s25 + $0xb8] sm:$0x3]  ;;  %v4692_v44 = vsel %vm325_vm1, %v396_v37, %v397_v9  ;;  %v401_v42 = vrot.slane %v4664_v51, 1 }
  0x28   : > { %6129 = vst [vmem:[#allocation23_spill] sm:$0xff] %v4667_v62  ;;  %3854 = vmatmul.mubr.msk.f32.gmra.mxu1 %vm408_vm2, %v4637_v29  ;;  %3832 = vmatprep.mubr.msk.f32.mxu0 %vm408_vm2, %v4640_v45  ;;  %6132 = vst [vmem:[#allocation26_spill] sm:$0xff] %v4683_v23  ;;  %v361_v29 = vrot.slane %v4656_v24, 1  ;;  %v362_v45 = vrot.slane %v4659_v40, 1  ;;  %v402_v18 = vrot.slane %v4667_v62, 1  ;;  %v4706_v22 = vsel %vm325_vm1, %v357_v12, %v359_v43 }
  0x29   : > { %3856 = vmatprep.mubr.msk.f32.mxu1 %vm408_vm2, %v4648_v50  ;;  %6133 = vst [vmem:[#allocation27_spill] sm:$0xff] %v4692_v44  ;;  %v4697_v52 = vld [vmem:[%s4375_s25 + $0x178] sm:$0x3]  ;;  %6134 = vst [vmem:[#allocation28_spill] sm:$0xff] %v4706_v22  ;;  %v364_v37 = vrot.slane %v4689_v56, 1  ;;  %v995_v50 = vrot.slane %v4378_v3, 2  ;;  %v4713_v62 = vsel %vm325_vm1, %v397_v9, %v399_v36 }
  0x2a   : > { %6135 = vst [vmem:[#allocation29_spill] sm:$0xff] %v4713_v62  ;;  %v4721_v43 = vsel %vm325_vm1, %v401_v42, %v402_v18  ;;  %v998_v12 = vrot.slane %v4393_v10, 2  ;;  %v1000_v10 = vrot.slane %v4401_v14, 2  ;;  %v1001_v42 = vrot.slane %v4406_v17, 2 }
  0x2b   : > { %3833 = vmatmul.mubr.msk.f32.gmra.mxu0 %vm408_vm2, %v4674_v7  ;;  %v4716_v7 = vsel %vm325_vm1, %v361_v29, %v362_v45  ;;  %6137 = vst [vmem:[#allocation31_spill] sm:$0xff] %v4721_v43  ;;  %v4731_v29 = vsel %vm325_vm1, %v362_v45, %v364_v37  ;;  %v1003_v37 = vrot.slane %v4428_v26, 2  ;;  %v1008_v26 = vrot.slane %v4469_v41, 2 }
  0x2c   : > { %3857 = vmatmul.mubr.msk.f32.gmra.mxu1 %vm408_vm2, %v4677_v49  ;;  %3835 = vmatprep.mubr.msk.f32.mxu0 %vm408_vm2, %v4683_v23  ;;  %6136 = vst [vmem:[#allocation30_spill] sm:$0xff] %v4716_v7  ;;  %v404_v49 = vrot.slane %v4697_v52, 1  ;;  %v996_v23 = vrot.slane %v4381_v4, 2  ;;  %6138 = vst [vmem:[#allocation32_spill] sm:$0xff] %v4731_v29  ;;  %v1013_v41 = vrot.slane %v4521_v60, 2 }
  0x2d   : > { %3859 = vmatprep.mubr.msk.f32.mxu1 %vm408_vm2, %v4692_v44 }
  0x2e   : > { %v4736_v36 = vsel %vm325_vm1, %v402_v18, %v404_v49  ;;  %v997_v9 = vsel %vm994_vm3, %v995_v50, %v996_v23  ;;  %v999_v45 = vsel %vm994_vm3, %v996_v23, %v998_v12  ;;  %v1005_v49 = vrot.slane %v4448_v33, 2  ;;  %v4772_v23 = vld [vmem:[%s6023_s1 + $0x18] sm:$0xf] }
  0x2f   : > { %3836 = vmatmul.mubr.msk.f32.gmra.mxu0 %vm408_vm2, %v4706_v22  ;;  %6139 = vst [vmem:[#allocation33_spill] sm:$0xff] %v4736_v36  ;;  %v1006_v50 = vrot.slane %v4451_v34, 2  ;;  %v4754_v18 = vsel %vm994_vm3, %v1000_v10, %v1001_v42  ;;  %v1011_v12 = vrot.slane %v4491_v48, 2 }
  0x30   : > { %3860 = vmatmul.mubr.msk.f32.gmra.mxu1 %vm408_vm2, %v4713_v62  ;;  %3838 = vmatprep.mubr.msk.f32.mxu0 %vm408_vm2, %v4716_v7 }
  0x31   : > { %3862 = vmatprep.mubr.msk.f32.mxu1 %vm408_vm2, %v4721_v43  ;;  %v4813_v60 = vsel %vm994_vm3, %v1011_v12, %v1013_v41  ;;  %v1025_v41 = vrot.slane %v4612_v59, 2 }
  0x33   : > { %3839 = vmatmul.mubr.msk.f32.gmra.mxu0 %vm408_vm2, %v4731_v29 }
  0x34   : > { %3863 = vmatmul.mubr.msk.f32.gmra.mxu1 %vm408_vm2, %v4736_v36  ;;  %3917 = vmatprep.mubr.msk.f32.mxu0 %vm408_vm2, %v997_v9  ;;  %v4759_v9 = vld [vmem:[%s6023_s1 + $0x14] sm:$0xf] }
  0x35   : > { %3867 = vmatprep.mubr.msk.f32.mxu1 %vm408_vm2, %v4378_v3  ;;  %v4766_v3 = vsel %vm994_vm3, %v1001_v42, %v1003_v37  ;;  %v1015_v42 = vrot.slane %v4508_v55, 2  ;;  %v1018_v37 = vrot.slane %v4557_v15, 2 }
  0x37   : > { %3918 = vmatmul.mubr.msk.f32.vlgmr.msra.gmra.mxu0 %vm408_vm2, %v999_v45  ;;  %v1016_v45 = vrot.slane %v4524_v61, 2 }
  0x38   : > { %3868 = vmatmul.mubr.msk.f32.vlgmr.msra.gmra.mxu1 %vm408_vm2, %v4381_v4  ;;  %4016 = vmatpush3.msk.msra.mxu0 %vm473_vm0, %v4436_v28  ;;  %v4779_v4 = vsel %vm994_vm3, %v1005_v49, %v1006_v50  ;;  %v1010_v28 = vrot.slane %v4488_v47, 2 }
  0x39   : > { %3966 = vmatpush3.msk.msra.mxu1 %vm473_vm0, %v4418_v21  ;;  %3870 = vmatprep.mubr.msk.f32.mxu1 %vm408_vm2, %v4401_v14  ;;  %v4796_v21 = vsel %vm994_vm3, %v1006_v50, %v1008_v26  ;;  %v4819_v49 = vsel %vm994_vm3, %v1015_v42, %v1016_v45  ;;  %v1020_v50 = vrot.slane %v4568_v25, 2  ;;  %v1021_v26 = vrot.slane %v4571_v30, 2 }
  0x3a   : > { %3920 = vmatprep.mubr.msk.f32.mxu0 %vm408_vm2, %v4754_v18  ;;  %4065 = vmatprep.subr.msk.mxu1 %vm473_vm0, %v4759_v9  ;;  %v4802_v10 = vsel %vm994_vm3, %v1010_v28, %v1011_v12  ;;  %v4830_v15 = vsel %vm994_vm3, %v1016_v45, %v1018_v37  ;;  %v1023_v28 = vrot.slane %v4601_v57, 2  ;;  %v1026_v42 = vrot.slane %v4615_v1, 2 }
  0x3b   : > { %3921 = vmatmul.mubr.msk.f32.gmra.mxu0 %vm408_vm2, %v4766_v3  ;;  %4115 = vmatprep.subr.msk.mxu0 %vm473_vm0, %v4772_v23  ;;  %6140 = vst [vmem:[#allocation34_spill] sm:$0xff] %v4830_v15  ;;  %v4836_v12 = vsel %vm994_vm3, %v1020_v50, %v1021_v26  ;;  %v1028_v45 = vrot.slane %v4645_v38, 2  ;;  %v1030_v50 = vrot.slane %v4656_v24, 2 }
  0x3c   : > { %3871 = vmatmul.mubr.msk.f32.gmra.mxu1 %vm408_vm2, %v4406_v17  ;;  %3923 = vmatprep.mubr.msk.f32.mxu0 %vm408_vm2, %v4779_v4  ;;  %v4847_v57 = vsel %vm994_vm3, %v1021_v26, %v1023_v28  ;;  %v4853_v37 = vsel %vm994_vm3, %v1025_v41, %v1026_v42  ;;  %v1033_v26 = vrot.slane %v4689_v56, 2  ;;  %v1035_v41 = vrot.slane %v4384_v5, 2 }
  0x3d   : > { %3873 = vmatprep.mubr.msk.f32.mxu1 %vm408_vm2, %v4448_v33  ;;  %6141 = vst [vmem:[#allocation35_spill] sm:$0xff] %v4847_v57  ;;  %v4864_v38 = vsel %vm994_vm3, %v1026_v42, %v1028_v45  ;;  %v1038_v42 = vrot.slane %v4398_v13, 2 }
  0x3e   : > { %6142 = vst [vmem:[#allocation36_spill] sm:$0xff] %v4864_v38 }
  0x3f   : > { %3924 = vmatmul.mubr.msk.f32.gmra.mxu0 %vm408_vm2, %v4796_v21 }
  0x40   : > { %3874 = vmatmul.mubr.msk.f32.gmra.mxu1 %vm408_vm2, %v4451_v34  ;;  %3926 = vmatprep.mubr.msk.f32.mxu0 %vm408_vm2, %v4802_v10 }
  0x41   : > { %3876 = vmatprep.mubr.msk.f32.mxu1 %vm408_vm2, %v4488_v47 }
  0x43   : > { %3927 = vmatmul.mubr.msk.f32.gmra.mxu0 %vm408_vm2, %v4813_v60 }
  0x44   : > { %3877 = vmatmul.mubr.msk.f32.gmra.mxu1 %vm408_vm2, %v4491_v48  ;;  %3929 = vmatprep.mubr.msk.f32.mxu0 %vm408_vm2, %v4819_v49 }
  0x45   : > { %3879 = vmatprep.mubr.msk.f32.mxu1 %vm408_vm2, %v4508_v55 }
  0x47   : > { %3930 = vmatmul.mubr.msk.f32.gmra.mxu0 %vm408_vm2, %v4830_v15  ;;  %v1031_v15 = vrot.slane %v4659_v40, 2 }
  0x48   : > { %3880 = vmatmul.mubr.msk.f32.gmra.mxu1 %vm408_vm2, %v4524_v61  ;;  %3932 = vmatprep.mubr.msk.f32.mxu0 %vm408_vm2, %v4836_v12 }
  0x49   : > { %3882 = vmatprep.mubr.msk.f32.mxu1 %vm408_vm2, %v4568_v25  ;;  %v4870_v28 = vsel %vm994_vm3, %v1030_v50, %v1031_v15  ;;  %v4881_v56 = vsel %vm994_vm3, %v1031_v15, %v1033_v26  ;;  %v1040_v50 = vrot.slane %v4410_v19, 2  ;;  %v1043_v15 = vrot.slane %v4431_v27, 2 }
  0x4a   : > { %6143 = vst [vmem:[#allocation37_spill] sm:$0xff] %v4881_v56 }
  0x4b   : > { %3933 = vmatmul.mubr.msk.f32.gmra.mxu0 %vm408_vm2, %v4847_v57  ;;  %v1036_v57 = vrot.slane %v4389_v8, 2 }
  0x4c   : > { %3883 = vmatmul.mubr.msk.f32.gmra.mxu1 %vm408_vm2, %v4571_v30  ;;  %3935 = vmatprep.mubr.msk.f32.mxu0 %vm408_vm2, %v4853_v37 }
  0x4d   : > { %3885 = vmatprep.mubr.msk.f32.mxu1 %vm408_vm2, %v4612_v59  ;;  %v4887_v45 = vsel %vm994_vm3, %v1035_v41, %v1036_v57  ;;  %v4898_v13 = vsel %vm994_vm3, %v1036_v57, %v1038_v42  ;;  %v1045_v41 = vrot.slane %v4454_v35, 2  ;;  %v1048_v57 = vrot.slane %v4485_v46, 2 }
  0x4e   : > { %6144 = vst [vmem:[#allocation38_spill] sm:$0xff] %v4898_v13 }
  0x4f   : > { %3936 = vmatmul.mubr.msk.f32.gmra.mxu0 %vm408_vm2, %v4864_v38  ;;  %v1041_v38 = vrot.slane %v4413_v20, 2 }
  0x50   : > { %3886 = vmatmul.mubr.msk.f32.gmra.mxu1 %vm408_vm2, %v4615_v1  ;;  %3938 = vmatprep.mubr.msk.f32.mxu0 %vm408_vm2, %v4870_v28 }
  0x51   : > { %3888 = vmatprep.mubr.msk.f32.mxu1 %vm408_vm2, %v4656_v24  ;;  %v4904_v26 = vsel %vm994_vm3, %v1040_v50, %v1041_v38  ;;  %v4915_v27 = vsel %vm994_vm3, %v1041_v38, %v1043_v15  ;;  %v1050_v50 = vrot.slane %v4502_v53, 2  ;;  %v1053_v38 = vrot.slane %v4537_v0, 2 }
  0x52   : > { %6145 = vst [vmem:[#allocation39_spill] sm:$0xff] %v4915_v27 }
  0x53   : > { %3939 = vmatmul.mubr.msk.f32.gmra.mxu0 %vm408_vm2, %v4881_v56  ;;  %v1046_v56 = vrot.slane %v4465_v39, 2 }
  0x54   : > { %3889 = vmatmul.mubr.msk.f32.gmra.mxu1 %vm408_vm2, %v4659_v40  ;;  %3941 = vmatprep.mubr.msk.f32.mxu0 %vm408_vm2, %v4887_v45 }
  0x55   : > { %3891 = vmatprep.mubr.msk.f32.mxu1 %vm408_vm2, %v4384_v5  ;;  %v4921_v42 = vsel %vm994_vm3, %v1045_v41, %v1046_v56  ;;  %v4932_v46 = vsel %vm994_vm3, %v1046_v56, %v1048_v57  ;;  %v1055_v41 = vrot.slane %v4541_v2, 2  ;;  %v1058_v56 = vrot.slane %v4560_v16, 2 }
  0x56   : > { %6146 = vst [vmem:[#allocation40_spill] sm:$0xff] %v4932_v46 }
  0x57   : > { %3942 = vmatmul.mubr.msk.f32.gmra.mxu0 %vm408_vm2, %v4898_v13  ;;  %v1051_v13 = vrot.slane %v4505_v54, 2 }
  0x58   : > { %3892 = vmatmul.mubr.msk.f32.gmra.mxu1 %vm408_vm2, %v4389_v8  ;;  %3944 = vmatprep.mubr.msk.f32.mxu0 %vm408_vm2, %v4904_v26 }
  0x59   : > { %3894 = vmatprep.mubr.msk.f32.mxu1 %vm408_vm2, %v4410_v19  ;;  %v4938_v15 = vsel %vm994_vm3, %v1050_v50, %v1051_v13  ;;  %v4949_v0 = vsel %vm994_vm3, %v1051_v13, %v1053_v38  ;;  %v1060_v50 = vrot.slane %v4576_v31, 2  ;;  %v1063_v13 = vrot.slane %v4604_v58, 2 }
  0x5a   : > { %6147 = vst [vmem:[#allocation41_spill] sm:$0xff] %v4938_v15  ;;  %6148 = vst [vmem:[#allocation42_spill] sm:$0xff] %v4949_v0 }
  0x5b   : > { %3945 = vmatmul.mubr.msk.f32.gmra.mxu0 %vm408_vm2, %v4915_v27  ;;  %v1056_v27 = vrot.slane %v4544_v6, 2 }
  0x5c   : > { %3895 = vmatmul.mubr.msk.f32.gmra.mxu1 %vm408_vm2, %v4413_v20  ;;  %3947 = vmatprep.mubr.msk.f32.mxu0 %vm408_vm2, %v4921_v42 }
  0x5d   : > { %3897 = vmatprep.mubr.msk.f32.mxu1 %vm408_vm2, %v4454_v35  ;;  %v4955_v57 = vsel %vm994_vm3, %v1055_v41, %v1056_v27  ;;  %v4966_v16 = vsel %vm994_vm3, %v1056_v27, %v1058_v56  ;;  %v1065_v41 = vrot.slane %v4620_v11, 2  ;;  %v1068_v27 = vrot.slane %v4653_v63, 2 }
  0x5e   : > { %6149 = vst [vmem:[#allocation43_spill] sm:$0xff] %v4955_v57  ;;  %6150 = vst [vmem:[#allocation44_spill] sm:$0xff] %v4966_v16 }
  0x5f   : > { %3948 = vmatmul.mubr.msk.f32.gmra.mxu0 %vm408_vm2, %v4932_v46  ;;  %v1061_v46 = vrot.slane %v4579_v32, 2 }
  0x60   : > { %3898 = vmatmul.mubr.msk.f32.gmra.mxu1 %vm408_vm2, %v4465_v39  ;;  %3950 = vmatprep.mubr.msk.f32.mxu0 %vm408_vm2, %v4938_v15 }
  0x61   : > { %3900 = vmatprep.mubr.msk.f32.mxu1 %vm408_vm2, %v4502_v53  ;;  %v4972_v38 = vsel %vm994_vm3, %v1060_v50, %v1061_v46  ;;  %v4983_v58 = vsel %vm994_vm3, %v1061_v46, %v1063_v13  ;;  %v1070_v50 = vrot.slane %v4664_v51, 2  ;;  %v1073_v46 = vrot.slane %v4697_v52, 2  ;;  %v6154_v52 = vld [vmem:[#allocation4_spill] sm:$0xff] }
  0x63   : > { %3951 = vmatmul.mubr.msk.f32.gmra.mxu0 %vm408_vm2, %v4949_v0  ;;  %v6151_v0 = vld [vmem:[#allocation18_spill] sm:$0xff] }
  0x64   : > { %3901 = vmatmul.mubr.msk.f32.gmra.mxu1 %vm408_vm2, %v4505_v54  ;;  %3953 = vmatprep.mubr.msk.f32.mxu0 %vm408_vm2, %v4955_v57  ;;  %v1066_v15 = vrot.slane %v6151_v0, 2 }
  0x65   : > { %3903 = vmatprep.mubr.msk.f32.mxu1 %vm408_vm2, %v4541_v2 }
  0x66   : > { %v4989_v56 = vsel %vm994_vm3, %v1065_v41, %v1066_v15  ;;  %v5000_v63 = vsel %vm994_vm3, %v1066_v15, %v1068_v27  ;;  %v6155_v41 = vld [vmem:[#allocation6_spill] sm:$0xff] }
  0x67   : > { %3954 = vmatmul.mubr.msk.f32.gmra.mxu0 %vm408_vm2, %v4966_v16  ;;  %v6152_v16 = vld [vmem:[#allocation23_spill] sm:$0xff]  ;;  %v5041_v27 = vld [vmem:[%s6023_s1 + $0x20] sm:$0xf] }
  0x68   : > { %3904 = vmatmul.mubr.msk.f32.gmra.mxu1 %vm408_vm2, %v4544_v6  ;;  %3956 = vmatprep.mubr.msk.f32.mxu0 %vm408_vm2, %v4972_v38  ;;  %v1071_v57 = vrot.slane %v6152_v16, 2 }
  0x69   : > { %3906 = vmatprep.mubr.msk.f32.mxu1 %vm408_vm2, %v4576_v31 }
  0x6a   : > { %v5006_v13 = vsel %vm994_vm3, %v1070_v50, %v1071_v57  ;;  %v5015_v15 = vsel %vm994_vm3, %v1071_v57, %v1073_v46  ;;  %v5032_v57 = vld [vmem:[%s6023_s1 + $0x1c] sm:$0xf]  ;;  %v6160_v50 = vld [vmem:[#allocation16_spill] sm:$0xff]  ;;  %v6161_v46 = vld [vmem:[#allocation19_spill] sm:$0xff] }
  0x6b   : > { %3957 = vmatmul.mubr.msk.f32.gmra.mxu0 %vm408_vm2, %v4983_v58  ;;  %6153 = vst [vmem:[#allocation18_spill] sm:$0xff] %v5015_v15 }
  0x6c   : > { %3907 = vmatmul.mubr.msk.f32.gmra.mxu1 %vm408_vm2, %v4579_v32  ;;  %3959 = vmatprep.mubr.msk.f32.mxu0 %vm408_vm2, %v4989_v56 }
  0x6d   : > { %3909 = vmatprep.mubr.msk.f32.mxu1 %vm408_vm2, %v4620_v11 }
  0x6f   : > { %3960 = vmatmul.mubr.msk.f32.gmra.mxu0 %vm408_vm2, %v5000_v63 }
  0x70   : > { %3910 = vmatmul.mubr.msk.f32.gmra.mxu1 %vm408_vm2, %v6151_v0  ;;  %3962 = vmatprep.mubr.msk.f32.mxu0 %vm408_vm2, %v5006_v13 }
  0x71   : > { %3912 = vmatprep.mubr.msk.f32.mxu1 %vm408_vm2, %v4664_v51 }
  0x73   : > { %3963 = vmatmul.mubr.msk.f32.gmra.mxu0 %vm408_vm2, %v5015_v15 }
  0x74   : > { %3913 = vmatmul.mubr.msk.f32.gmra.mxu1 %vm408_vm2, %v6152_v16  ;;  %4017 = vmatprep.mubr.msk.f32.mxu0 %vm408_vm2, %v6154_v52  ;;  %v6162_v52 = vld [vmem:[#allocation21_spill] sm:$0xff] }
  0x75   : > { %3967 = vmatprep.mubr.msk.f32.mxu1 %vm408_vm2, %v4401_v14  ;;  %v6156_v14 = vld [vmem:[#allocation8_spill] sm:$0xff] }
  0x77   : > { %4018 = vmatmul.mubr.msk.f32.vlgmr.msra.gmra.mxu0 %vm408_vm2, %v6155_v41  ;;  %v6163_v41 = vld [vmem:[#allocation24_spill] sm:$0xff] }
  0x78   : > { %3968 = vmatmul.mubr.msk.f32.vlgmr.msra.gmra.mxu1 %vm408_vm2, %v4406_v17  ;;  %4116 = vmatpush3.msk.msra.mxu0 %vm473_vm0, %v4772_v23  ;;  %v6157_v17 = vld [vmem:[#allocation10_spill] sm:$0xff]  ;;  %v6158_v23 = vld [vmem:[#allocation12_spill] sm:$0xff] }
  0x79   : > { %4066 = vmatpush3.msk.msra.mxu1 %vm473_vm0, %v4759_v9  ;;  %3970 = vmatprep.mubr.msk.f32.mxu1 %vm408_vm2, %v4448_v33  ;;  %v6159_v9 = vld [vmem:[#allocation14_spill] sm:$0xff] }
  0x7a   : > { %4020 = vmatprep.mubr.msk.f32.mxu0 %vm408_vm2, %v6156_v14  ;;  %4165 = vmatprep.subr.msk.mxu1 %vm473_vm0, %v5032_v57 }
  0x7b   : > { %4021 = vmatmul.mubr.msk.f32.gmra.mxu0 %vm408_vm2, %v6157_v17  ;;  %4215 = vmatprep.subr.msk.mxu0 %vm473_vm0, %v5041_v27 }
  0x7c   : > { %3971 = vmatmul.mubr.msk.f32.gmra.mxu1 %vm408_vm2, %v4451_v34  ;;  %4023 = vmatprep.mubr.msk.f32.mxu0 %vm408_vm2, %v6158_v23 }
  0x7d   : > { %3973 = vmatprep.mubr.msk.f32.mxu1 %vm408_vm2, %v4488_v47 }
  0x7f   : > { %4024 = vmatmul.mubr.msk.f32.gmra.mxu0 %vm408_vm2, %v6159_v9 }
  0x80   : > { %3974 = vmatmul.mubr.msk.f32.gmra.mxu1 %vm408_vm2, %v4491_v48  ;;  %4026 = vmatprep.mubr.msk.f32.mxu0 %vm408_vm2, %v6160_v50  ;;  %v6164_v50 = vld [vmem:[#allocation26_spill] sm:$0xff] }
  0x81   : > { %3976 = vmatprep.mubr.msk.f32.mxu1 %vm408_vm2, %v4508_v55 }
  0x83   : > { %4027 = vmatmul.mubr.msk.f32.gmra.mxu0 %vm408_vm2, %v6161_v46 }
  0x84   : > { %3977 = vmatmul.mubr.msk.f32.gmra.mxu1 %vm408_vm2, %v4524_v61  ;;  %4029 = vmatprep.mubr.msk.f32.mxu0 %vm408_vm2, %v6162_v52  ;;  %v5158_v52 = vld [vmem:[%s4375_s25 + $0x190] sm:$0x3] }
  0x85   : > { %3979 = vmatprep.mubr.msk.f32.mxu1 %vm408_vm2, %v4568_v25 }
  0x87   : > { %4030 = vmatmul.mubr.msk.f32.gmra.mxu0 %vm408_vm2, %v6163_v41  ;;  %v5145_v41 = vld [vmem:[%s4375_s25 + $0x188] sm:$0xff] }
  0x88   : > { %3980 = vmatmul.mubr.msk.f32.gmra.mxu1 %vm408_vm2, %v4571_v30  ;;  %4032 = vmatprep.mubr.msk.f32.mxu0 %vm408_vm2, %v6164_v50  ;;  %v6165_v50 = vld [vmem:[#allocation2_spill] sm:$0xff] }
  0x89   : > { %3982 = vmatprep.mubr.msk.f32.mxu1 %vm408_vm2, %v4612_v59 }
  0x8b   : > { %4033 = vmatmul.mubr.msk.f32.gmra.mxu0 %vm408_vm2, %v4706_v22  ;;  %v6166_v22 = vld [vmem:[#allocation3_spill] sm:$0xff] }
  0x8c   : > { %3983 = vmatmul.mubr.msk.f32.gmra.mxu1 %vm408_vm2, %v4615_v1  ;;  %4035 = vmatprep.mubr.msk.f32.mxu0 %vm408_vm2, %v4716_v7  ;;  %v6167_v7 = vld [vmem:[#allocation5_spill] sm:$0xff] }
  0x8d   : > { %3985 = vmatprep.mubr.msk.f32.mxu1 %vm408_vm2, %v4656_v24 }
  0x8f   : > { %4036 = vmatmul.mubr.msk.f32.gmra.mxu0 %vm408_vm2, %v4731_v29  ;;  %v6168_v29 = vld [vmem:[#allocation7_spill] sm:$0xff] }
  0x90   : > { %3986 = vmatmul.mubr.msk.f32.gmra.mxu1 %vm408_vm2, %v4659_v40  ;;  %4038 = vmatprep.mubr.msk.f32.mxu0 %vm408_vm2, %v6165_v50  ;;  %v6169_v50 = vld [vmem:[#allocation9_spill] sm:$0xff] }
  0x91   : > { %3988 = vmatprep.mubr.msk.f32.mxu1 %vm408_vm2, %v4384_v5 }
  0x93   : > { %4039 = vmatmul.mubr.msk.f32.gmra.mxu0 %vm408_vm2, %v6166_v22  ;;  %v6170_v22 = vld [vmem:[#allocation11_spill] sm:$0xff] }
  0x94   : > { %3989 = vmatmul.mubr.msk.f32.gmra.mxu1 %vm408_vm2, %v4389_v8  ;;  %4041 = vmatprep.mubr.msk.f32.mxu0 %vm408_vm2, %v6167_v7  ;;  %v6171_v7 = vld [vmem:[#allocation13_spill] sm:$0xff] }
  0x95   : > { %3991 = vmatprep.mubr.msk.f32.mxu1 %vm408_vm2, %v4410_v19 }
  0x97   : > { %4042 = vmatmul.mubr.msk.f32.gmra.mxu0 %vm408_vm2, %v6168_v29  ;;  %v6172_v29 = vld [vmem:[#allocation15_spill] sm:$0xff] }
  0x98   : > { %3992 = vmatmul.mubr.msk.f32.gmra.mxu1 %vm408_vm2, %v4413_v20  ;;  %4044 = vmatprep.mubr.msk.f32.mxu0 %vm408_vm2, %v6169_v50  ;;  %v6173_v50 = vld [vmem:[#allocation17_spill] sm:$0xff] }
  0x99   : > { %3994 = vmatprep.mubr.msk.f32.mxu1 %vm408_vm2, %v4454_v35 }
  0x9b   : > { %4045 = vmatmul.mubr.msk.f32.gmra.mxu0 %vm408_vm2, %v6170_v22  ;;  %v6174_v22 = vld [vmem:[#allocation20_spill] sm:$0xff] }
  0x9c   : > { %3995 = vmatmul.mubr.msk.f32.gmra.mxu1 %vm408_vm2, %v4465_v39  ;;  %4047 = vmatprep.mubr.msk.f32.mxu0 %vm408_vm2, %v6171_v7  ;;  %v6175_v7 = vld [vmem:[#allocation22_spill] sm:$0xff] }
  0x9d   : > { %3997 = vmatprep.mubr.msk.f32.mxu1 %vm408_vm2, %v4502_v53 }
  0x9f   : > { %4048 = vmatmul.mubr.msk.f32.gmra.mxu0 %vm408_vm2, %v6172_v29  ;;  %v5142_v29 = vld [vmem:[%s4375_s25 + $0x180] sm:$0xff] }
  0xa0   : > { %3998 = vmatmul.mubr.msk.f32.gmra.mxu1 %vm408_vm2, %v4505_v54  ;;  %4050 = vmatprep.mubr.msk.f32.mxu0 %vm408_vm2, %v6173_v50  ;;  %v6176_v50 = vld [vmem:[#allocation25_spill] sm:$0xff] }
  0xa1   : > { %4000 = vmatprep.mubr.msk.f32.mxu1 %vm408_vm2, %v4541_v2 }
  0xa3   : > { %4051 = vmatmul.mubr.msk.f32.gmra.mxu0 %vm408_vm2, %v6174_v22  ;;  %v1671_v22 = vrot.slane %v5145_v41, 1 }
  0xa4   : > { %4001 = vmatmul.mubr.msk.f32.gmra.mxu1 %vm408_vm2, %v4544_v6  ;;  %4053 = vmatprep.mubr.msk.f32.mxu0 %vm408_vm2, %v6175_v7  ;;  %v1670_v7 = vrot.slane %v5142_v29, 1 }
  0xa5   : > { %4003 = vmatprep.mubr.msk.f32.mxu1 %vm408_vm2, %v4576_v31 }
  0xa7   : > { %4054 = vmatmul.mubr.msk.f32.gmra.mxu0 %vm408_vm2, %v6176_v50  ;;  %v5170_v50 = vsel %vm325_vm1, %v1670_v7, %v1671_v22 }
  0xa8   : > { %4004 = vmatmul.mubr.msk.f32.gmra.mxu1 %vm408_vm2, %v4579_v32  ;;  %4056 = vmatprep.mubr.msk.f32.mxu0 %vm408_vm2, %v4692_v44  ;;  %v1673_v44 = vrot.slane %v5158_v52, 1  ;;  %6177 = vst [vmem:[#allocation23_spill] sm:$0xff] %v5170_v50 }
  0xa9   : > { %4006 = vmatprep.mubr.msk.f32.mxu1 %vm408_vm2, %v4620_v11 }
  0xab   : > { %4057 = vmatmul.mubr.msk.f32.gmra.mxu0 %vm408_vm2, %v4713_v62  ;;  %v5179_v62 = vsel %vm325_vm1, %v1671_v22, %v1673_v44  ;;  %v6189_v22 = vld [vmem:[#allocation44_spill] sm:$0xff] }
  0xac   : > { %4007 = vmatmul.mubr.msk.f32.gmra.mxu1 %vm408_vm2, %v6151_v0  ;;  %4059 = vmatprep.mubr.msk.f32.mxu0 %vm408_vm2, %v4721_v43  ;;  %6178 = vst [vmem:[#allocation4_spill] sm:$0xff] %v5179_v62 }
  0xad   : > { %4009 = vmatprep.mubr.msk.f32.mxu1 %vm408_vm2, %v4664_v51 }
  0xaf   : > { %4060 = vmatmul.mubr.msk.f32.gmra.mxu0 %vm408_vm2, %v4736_v36  ;;  %v5356_v36 = vld [vmem:[%s4375_s25 + $0x198] sm:$0xff] }
  0xb0   : > { %4010 = vmatmul.mubr.msk.f32.gmra.mxu1 %vm408_vm2, %v6152_v16  ;;  %4062 = vmatprep.mubr.msk.f32.mxu0 %vm408_vm2, %v5170_v50 }
  0xb1   : > { %4012 = vmatprep.mubr.msk.f32.mxu1 %vm408_vm2, %v5142_v29 }
  0xb3   : > { %4063 = vmatmul.mubr.msk.f32.gmra.mxu0 %vm408_vm2, %v5179_v62 }
  0xb4   : > { %4013 = vmatmul.mubr.msk.f32.gmra.mxu1 %vm408_vm2, %v5145_v41  ;;  %4117 = vmatprep.mubr.msk.f32.mxu0 %vm408_vm2, %v4448_v33  ;;  %v6179_v33 = vld [vmem:[#allocation34_spill] sm:$0xff] }
  0xb5   : > { %4067 = vmatprep.mubr.msk.f32.mxu1 %vm408_vm2, %v4754_v18 }
  0xb7   : > { %4118 = vmatmul.mubr.msk.f32.vlgmr.msra.gmra.mxu0 %vm408_vm2, %v4451_v34  ;;  %v6180_v34 = vld [vmem:[#allocation35_spill] sm:$0xff] }
  0xb8   : > { %4068 = vmatmul.mubr.msk.f32.vlgmr.msra.gmra.mxu1 %vm408_vm2, %v4766_v3  ;;  %4216 = vmatpush3.msk.msra.mxu0 %vm473_vm0, %v5041_v27 }
  0xb9   : > { %4166 = vmatpush3.msk.msra.mxu1 %vm473_vm0, %v5032_v57  ;;  %4070 = vmatprep.mubr.msk.f32.mxu1 %vm408_vm2, %v4779_v4  ;;  %v1941_v57 = vrot.slane %v5142_v29, 2 }
  0xba   : > { %4120 = vmatprep.mubr.msk.f32.mxu0 %vm408_vm2, %v4488_v47  ;;  %v6181_v47 = vld [vmem:[#allocation36_spill] sm:$0xff] }
  0xbb   : > { %4121 = vmatmul.mubr.msk.f32.gmra.mxu0 %vm408_vm2, %v4491_v48  ;;  %v6182_v48 = vld [vmem:[#allocation37_spill] sm:$0xff] }
  0xbc   : > { %4071 = vmatmul.mubr.msk.f32.gmra.mxu1 %vm408_vm2, %v4796_v21  ;;  %4123 = vmatprep.mubr.msk.f32.mxu0 %vm408_vm2, %v4508_v55  ;;  %v6183_v55 = vld [vmem:[#allocation38_spill] sm:$0xff] }
  0xbd   : > { %4073 = vmatprep.mubr.msk.f32.mxu1 %vm408_vm2, %v4802_v10 }
  0xbf   : > { %4124 = vmatmul.mubr.msk.f32.gmra.mxu0 %vm408_vm2, %v4524_v61 }
  0xc0   : > { %4074 = vmatmul.mubr.msk.f32.gmra.mxu1 %vm408_vm2, %v4813_v60  ;;  %4126 = vmatprep.mubr.msk.f32.mxu0 %vm408_vm2, %v4568_v25  ;;  %v6185_v25 = vld [vmem:[#allocation40_spill] sm:$0xff] }
  0xc1   : > { %4076 = vmatprep.mubr.msk.f32.mxu1 %vm408_vm2, %v4819_v49 }
  0xc3   : > { %4127 = vmatmul.mubr.msk.f32.gmra.mxu0 %vm408_vm2, %v4571_v30  ;;  %v6186_v30 = vld [vmem:[#allocation41_spill] sm:$0xff] }
  0xc4   : > { %4077 = vmatmul.mubr.msk.f32.gmra.mxu1 %vm408_vm2, %v6179_v33  ;;  %4129 = vmatprep.mubr.msk.f32.mxu0 %vm408_vm2, %v4612_v59 }
  0xc5   : > { %4079 = vmatprep.mubr.msk.f32.mxu1 %vm408_vm2, %v4836_v12 }
  0xc7   : > { %4130 = vmatmul.mubr.msk.f32.gmra.mxu0 %vm408_vm2, %v4615_v1 }
  0xc8   : > { %4080 = vmatmul.mubr.msk.f32.gmra.mxu1 %vm408_vm2, %v6180_v34  ;;  %4132 = vmatprep.mubr.msk.f32.mxu0 %vm408_vm2, %v4656_v24  ;;  %v6187_v24 = vld [vmem:[#allocation42_spill] sm:$0xff] }
  0xc9   : > { %4082 = vmatprep.mubr.msk.f32.mxu1 %vm408_vm2, %v4853_v37 }
  0xcb   : > { %4133 = vmatmul.mubr.msk.f32.gmra.mxu0 %vm408_vm2, %v4659_v40  ;;  %v6188_v40 = vld [vmem:[#allocation43_spill] sm:$0xff] }
  0xcc   : > { %4083 = vmatmul.mubr.msk.f32.gmra.mxu1 %vm408_vm2, %v6181_v47  ;;  %4135 = vmatprep.mubr.msk.f32.mxu0 %vm408_vm2, %v4384_v5 }
  0xcd   : > { %4085 = vmatprep.mubr.msk.f32.mxu1 %vm408_vm2, %v4870_v28 }
  0xcf   : > { %4136 = vmatmul.mubr.msk.f32.gmra.mxu0 %vm408_vm2, %v4389_v8 }
  0xd0   : > { %4086 = vmatmul.mubr.msk.f32.gmra.mxu1 %vm408_vm2, %v6182_v48  ;;  %4138 = vmatprep.mubr.msk.f32.mxu0 %vm408_vm2, %v4410_v19  ;;  %v6184_v19 = vld [vmem:[#allocation39_spill] sm:$0xff] }
  0xd1   : > { %4088 = vmatprep.mubr.msk.f32.mxu1 %vm408_vm2, %v4887_v45 }
  0xd3   : > { %4139 = vmatmul.mubr.msk.f32.gmra.mxu0 %vm408_vm2, %v4413_v20 }
  0xd4   : > { %4089 = vmatmul.mubr.msk.f32.gmra.mxu1 %vm408_vm2, %v6183_v55  ;;  %4141 = vmatprep.mubr.msk.f32.mxu0 %vm408_vm2, %v4454_v35 }
  0xd5   : > { %4091 = vmatprep.mubr.msk.f32.mxu1 %vm408_vm2, %v4904_v26 }
  0xd7   : > { %v5259_v5 = vpop.f32.mrf.mxu0  ;;  %4142 = vmatmul.mubr.msk.f32.gmra.mxu0 %vm408_vm2, %v4465_v39 }
  0xd8   : > { %v5263_v8 = vpop.f32.mrf.mxu1  ;;  %4092 = vmatmul.mubr.msk.f32.gmra.mxu1 %vm408_vm2, %v6184_v19  ;;  %4144 = vmatprep.mubr.msk.f32.mxu0 %vm408_vm2, %v4502_v53 }
  0xd9   : > { %v5269_v20 = vpop.f32.mrf.mxu0  ;;  %4094 = vmatprep.mubr.msk.f32.mxu1 %vm408_vm2, %v4921_v42 }
  0xda   : > { %v5273_v35 = vpop.f32.mrf.mxu1 }
  0xdb   : > { %v5275_v61 = vpop.f32.mrf.mxu0  ;;  %4145 = vmatmul.mubr.msk.f32.gmra.mxu0 %vm408_vm2, %v4505_v54 }
  0xdc   : > { %v5279_v39 = vpop.f32.mrf.mxu1  ;;  %4095 = vmatmul.mubr.msk.f32.gmra.mxu1 %vm408_vm2, %v6185_v25  ;;  %4147 = vmatprep.mubr.msk.f32.mxu0 %vm408_vm2, %v4541_v2 }
  0xdd   : > { %v5285_v53 = vpop.f32.mrf.mxu0  ;;  %4097 = vmatprep.mubr.msk.f32.mxu1 %vm408_vm2, %v6186_v30 }
  0xde   : > { %v5289_v59 = vpop.f32.mrf.mxu1 }
  0xdf   : > { %v5291_v1 = vpop.f32.mrf.mxu0  ;;  %4148 = vmatmul.mubr.msk.f32.gmra.mxu0 %vm408_vm2, %v4544_v6 }
  0xe0   : > { %v5295_v54 = vpop.f32.mrf.mxu1  ;;  %4098 = vmatmul.mubr.msk.f32.gmra.mxu1 %vm408_vm2, %v6187_v24  ;;  %4150 = vmatprep.mubr.msk.f32.mxu0 %vm408_vm2, %v4576_v31 }
  0xe1   : > { %v5301_v2 = vpop.f32.mrf.mxu0  ;;  %4100 = vmatprep.mubr.msk.f32.mxu1 %vm408_vm2, %v6188_v40 }
  0xe2   : > { %v5305_v7 = vpop.f32.mrf.mxu1 }
  0xe3   : > { %v5307_v44 = vpop.f32.mrf.mxu0  ;;  %4151 = vmatmul.mubr.msk.f32.gmra.mxu0 %vm408_vm2, %v4579_v32 }
  0xe4   : > { %v5311_v6 = vpop.f32.mrf.mxu1  ;;  %4101 = vmatmul.mubr.msk.f32.gmra.mxu1 %vm408_vm2, %v6189_v22  ;;  %4153 = vmatprep.mubr.msk.f32.mxu0 %vm408_vm2, %v4620_v11 }
  0xe5   : > { %v5317_v31 = vpop.f32.mrf.mxu0  ;;  %4103 = vmatprep.mubr.msk.f32.mxu1 %vm408_vm2, %v4972_v38 }
  0xe6   : > { %v5321_v18 = vpop.f32.mrf.mxu1 }
  0xe7   : > { %v5323_v3 = vpop.f32.mrf.mxu0  ;;  %4154 = vmatmul.mubr.msk.f32.gmra.mxu0 %vm408_vm2, %v6151_v0  ;;  %v1942_v0 = vrot.slane %v5145_v41, 2 }
  0xe8   : > { %v5327_v32 = vpop.f32.mrf.mxu1  ;;  %4104 = vmatmul.mubr.msk.f32.gmra.mxu1 %vm408_vm2, %v4983_v58  ;;  %4156 = vmatprep.mubr.msk.f32.mxu0 %vm408_vm2, %v4664_v51 }
  0xe9   : > { %6190 = vst [vmem:[#allocation6_spill] sm:$0xff] %v5327_v32  ;;  %v5333_v11 = vpop.f32.mrf.mxu0  ;;  %4106 = vmatprep.mubr.msk.f32.mxu1 %vm408_vm2, %v4989_v56  ;;  %v5375_v32 = vld [vmem:[%s4375_s25 + $0x1a0] sm:$0xff] }
  0xea   : > { %v5338_v27 = vpop.f32.mrf.mxu1 }
  0xeb   : > { %6191 = vst [vmem:[#allocation8_spill] sm:$0xff] %v5338_v27  ;;  %v5341_v62 = vpop.f32.mrf.mxu0  ;;  %4157 = vmatmul.mubr.msk.f32.gmra.mxu0 %vm408_vm2, %v6152_v16  ;;  %v1944_v27 = vrot.slane %v5158_v52, 2  ;;  %v5362_v16 = vsel %vm994_vm3, %v1941_v57, %v1942_v0 }
  0xec   : > { %v5345_v50 = vpop.f32.mrf.mxu1  ;;  %4107 = vmatmul.mubr.msk.f32.gmra.mxu1 %vm408_vm2, %v5000_v63  ;;  %4159 = vmatprep.mubr.msk.f32.mxu0 %vm408_vm2, %v5142_v29  ;;  %6194 = vst [vmem:[#allocation14_spill] sm:$0xff] %v5362_v16 }
  0xed   : > { %6192 = vst [vmem:[#allocation10_spill] sm:$0xff] %v5345_v50  ;;  %v5351_v51 = vpop.f32.mrf.mxu0  ;;  %4109 = vmatprep.mubr.msk.f32.mxu1 %vm408_vm2, %v5006_v13  ;;  %v5382_v57 = vsel %vm994_vm3, %v1942_v0, %v1944_v27 }
  0xee   : > { %v5359_v43 = vpop.f32.mrf.mxu1  ;;  %6196 = vst [vmem:[#allocation34_spill] sm:$0xff] %v5382_v57 }
  0xef   : > { %6193 = vst [vmem:[#allocation12_spill] sm:$0xff] %v5359_v43  ;;  %v5364_v50 = vpop.f32.mrf.mxu0  ;;  %4160 = vmatmul.mubr.msk.f32.gmra.mxu0 %vm408_vm2, %v5145_v41 }
  0xf0   : > { %v5368_v29 = vpop.f32.mrf.mxu1  ;;  %4110 = vmatmul.mubr.msk.f32.gmra.mxu1 %vm408_vm2, %v5015_v15  ;;  %4162 = vmatprep.mubr.msk.f32.mxu0 %vm408_vm2, %v5356_v36 }
  0xf1   : > { %6195 = vst [vmem:[#allocation19_spill] sm:$0xff] %v5368_v29  ;;  %v5377_v52 = vpop.f32.mrf.mxu0  ;;  %4112 = vmatprep.mubr.msk.f32.mxu1 %vm408_vm2, %v5362_v16 }
  0xf2   : > { %v5384_v43 = vpop.f32.mrf.mxu1 }
  0xf3   : > { %6197 = vst [vmem:[#allocation35_spill] sm:$0xff] %v5384_v43  ;;  %v5386_v41 = vpop.f32.mrf.mxu0  ;;  %4163 = vmatmul.mubr.msk.f32.gmra.mxu0 %vm408_vm2, %v5375_v32 }
  0xf4   : > { %v5390_v29 = vpop.f32.mrf.mxu1  ;;  %4113 = vmatmul.mubr.msk.f32.gmra.mxu1 %vm408_vm2, %v5382_v57  ;;  %4217 = vmatprep.mubr.msk.f32.mxu0 %vm408_vm2, %v4779_v4 }
  0xf5   : > { %6198 = vst [vmem:[#allocation36_spill] sm:$0xff] %v5390_v29  ;;  %v5396_v15 = vpop.f32.mrf.mxu0  ;;  %4167 = vmatprep.mubr.msk.f32.mxu1 %vm408_vm2, %v6156_v14 }
  0xf6   : > { %v5400_v27 = vpop.f32.mrf.mxu1 }
  0xf7   : > { %6199 = vst [vmem:[#allocation37_spill] sm:$0xff] %v5400_v27  ;;  %v3919_v0 = vpop.f32.mrf.mxu0  ;;  %4218 = vmatmul.mubr.msk.f32.vlgmr.msra.gmra.mxu0 %vm408_vm2, %v4796_v21 }
  0xf8   : > { %v3869_v43 = vpop.f32.mrf.mxu1  ;;  %4168 = vmatmul.mubr.msk.f32.vlgmr.msra.gmra.mxu1 %vm408_vm2, %v6157_v17  ;;  %4220 = vmatprep.mubr.msk.f32.mxu0 %vm408_vm2, %v4802_v10 }
  0xf9   : > { %v841_v4 = vadd.f32 %v3869_v43, %v5259_v5  ;;  %v1210_v29 = vpop.f32.mrf.mxu0  ;;  %4170 = vmatprep.mubr.msk.f32.mxu1 %vm408_vm2, %v6158_v23  ;;  %v6200_v23 = vld [vmem:[#allocation16_spill] sm:$0xff] }
  0xfa   : > { %v835_v14 = vpop.f32.mrf.mxu1 }
  0xfb   : > { %v5411_v57 = vadd.f32 %v3919_v0, %v841_v4  ;;  %v836_v27 = vadd.f32 %v835_v14, %v5269_v20  ;;  %v3922_v16 = vpop.f32.mrf.mxu0  ;;  %4221 = vmatmul.mubr.msk.f32.gmra.mxu0 %vm408_vm2, %v4813_v60  ;;  %v6202_v14 = vld [vmem:[#allocation24_spill] sm:$0xff] }
  0xfc   : > { %v3872_v21 = vpop.f32.mrf.mxu1  ;;  %4171 = vmatmul.mubr.msk.f32.gmra.mxu1 %vm408_vm2, %v6159_v9  ;;  %4223 = vmatprep.mubr.msk.f32.mxu0 %vm408_vm2, %v4819_v49 }
  0xfd   : > { %v5420_v43 = vadd.f32 %v1210_v29, %v836_v27  ;;  %v851_v10 = vadd.f32 %v3872_v21, %v5275_v61  ;;  %v1220_v17 = vpop.f32.mrf.mxu0  ;;  %4173 = vmatprep.mubr.msk.f32.mxu1 %vm408_vm2, %v6200_v23 }
  0xfe   : > { %v845_v5 = vpop.f32.mrf.mxu1 }
  0xff   : > { %v5425_v20 = vadd.f32 %v3922_v16, %v851_v10  ;;  %v846_v60 = vadd.f32 %v845_v5, %v5285_v53  ;;  %v3925_v0 = vpop.f32.mrf.mxu0  ;;  %4224 = vmatmul.mubr.msk.f32.gmra.mxu0 %vm408_vm2, %v6179_v33  ;;  %v6201_v16 = vld [vmem:[#allocation21_spill] sm:$0xff]  ;;  %v6203_v10 = vld [vmem:[#allocation26_spill] sm:$0xff] }
 0x100   : > { %v3875_v9 = vpop.f32.mrf.mxu1  ;;  %4174 = vmatmul.mubr.msk.f32.gmra.mxu1 %vm408_vm2, %v6161_v46  ;;  %4226 = vmatprep.mubr.msk.f32.mxu0 %vm408_vm2, %v4836_v12 }
 0x101   : > { %v5434_v49 = vadd.f32 %v1220_v17, %v846_v60  ;;  %v861_v61 = vadd.f32 %v3875_v9, %v5291_v1  ;;  %v1230_v29 = vpop.f32.mrf.mxu0  ;;  %4176 = vmatprep.mubr.msk.f32.mxu1 %vm408_vm2, %v6201_v16  ;;  %v6204_v60 = vld [vmem:[#allocation28_spill] sm:$0xff]  ;;  %v6205_v9 = vld [vmem:[#allocation30_spill] sm:$0xff] }
 0x102   : > { %v855_v53 = vpop.f32.mrf.mxu1 }
 0x103   : > { %v5439_v27 = vadd.f32 %v3925_v0, %v861_v61  ;;  %v856_v33 = vadd.f32 %v855_v53, %v5301_v2  ;;  %v3928_v4 = vpop.f32.mrf.mxu0  ;;  %4227 = vmatmul.mubr.msk.f32.gmra.mxu0 %vm408_vm2, %v6180_v34  ;;  %v6206_v53 = vld [vmem:[#allocation32_spill] sm:$0xff] }
 0x104   : > { %v3878_v46 = vpop.f32.mrf.mxu1  ;;  %4177 = vmatmul.mubr.msk.f32.gmra.mxu1 %vm408_vm2, %v6202_v14  ;;  %4229 = vmatprep.mubr.msk.f32.mxu0 %vm408_vm2, %v4853_v37 }
 0x105   : > { %v5448_v12 = vadd.f32 %v1230_v29, %v856_v33  ;;  %v871_v1 = vadd.f32 %v3878_v46, %v5307_v44  ;;  %v1240_v21 = vpop.f32.mrf.mxu0  ;;  %4179 = vmatprep.mubr.msk.f32.mxu1 %vm408_vm2, %v6203_v10 }
 0x106   : > { %v865_v2 = vpop.f32.mrf.mxu1 }
 0x107   : > { %v5453_v17 = vadd.f32 %v3928_v4, %v871_v1  ;;  %v866_v34 = vadd.f32 %v865_v2, %v5317_v31  ;;  %v3931_v23 = vpop.f32.mrf.mxu0  ;;  %4230 = vmatmul.mubr.msk.f32.gmra.mxu0 %vm408_vm2, %v6181_v47  ;;  %v6207_v4 = vld [vmem:[#allocation2_spill] sm:$0xff]  ;;  %v6209_v2 = vld [vmem:[#allocation5_spill] sm:$0xff] }
 0x108   : > { %v3881_v5 = vpop.f32.mrf.mxu1  ;;  %4180 = vmatmul.mubr.msk.f32.gmra.mxu1 %vm408_vm2, %v6204_v60  ;;  %4232 = vmatprep.mubr.msk.f32.mxu0 %vm408_vm2, %v4870_v28  ;;  %v6210_v60 = vld [vmem:[#allocation7_spill] sm:$0xff] }
 0x109   : > { %v5462_v37 = vadd.f32 %v1240_v21, %v866_v34  ;;  %v881_v44 = vadd.f32 %v3881_v5, %v5323_v3  ;;  %v1250_v0 = vpop.f32.mrf.mxu0  ;;  %4182 = vmatprep.mubr.msk.f32.mxu1 %vm408_vm2, %v6205_v9  ;;  %v6208_v21 = vld [vmem:[#allocation3_spill] sm:$0xff] }
 0x10a   : > { %v875_v31 = vpop.f32.mrf.mxu1 }
 0x10b   : > { %v5467_v61 = vadd.f32 %v3931_v23, %v881_v44  ;;  %v876_v47 = vadd.f32 %v875_v31, %v5333_v11  ;;  %v3934_v29 = vpop.f32.mrf.mxu0  ;;  %4233 = vmatmul.mubr.msk.f32.gmra.mxu0 %vm408_vm2, %v6182_v48 }
 0x10c   : > { %v3884_v16 = vpop.f32.mrf.mxu1  ;;  %4183 = vmatmul.mubr.msk.f32.gmra.mxu1 %vm408_vm2, %v6206_v53  ;;  %4235 = vmatprep.mubr.msk.f32.mxu0 %vm408_vm2, %v4887_v45  ;;  %v6213_v53 = vld [vmem:[#allocation13_spill] sm:$0xff] }
 0x10d   : > { %v5476_v28 = vadd.f32 %v1250_v0, %v876_v47  ;;  %v891_v3 = vadd.f32 %v3884_v16, %v5341_v62  ;;  %v1260_v33 = vpop.f32.mrf.mxu0  ;;  %4185 = vmatprep.mubr.msk.f32.mxu1 %vm408_vm2, %v6207_v4  ;;  %v6211_v0 = vld [vmem:[#allocation9_spill] sm:$0xff] }
 0x10e   : > { %v885_v11 = vpop.f32.mrf.mxu1 }
 0x10f   : > { %v5481_v46 = vadd.f32 %v3934_v29, %v891_v3  ;;  %v886_v48 = vadd.f32 %v885_v11, %v5351_v51  ;;  %v3937_v14 = vpop.f32.mrf.mxu0  ;;  %4236 = vmatmul.mubr.msk.f32.gmra.mxu0 %vm408_vm2, %v6183_v55  ;;  %v6212_v29 = vld [vmem:[#allocation11_spill] sm:$0xff] }
 0x110   : > { %v3887_v1 = vpop.f32.mrf.mxu1  ;;  %4186 = vmatmul.mubr.msk.f32.gmra.mxu1 %vm408_vm2, %v6208_v21  ;;  %4238 = vmatprep.mubr.msk.f32.mxu0 %vm408_vm2, %v4904_v26  ;;  %v6214_v11 = vld [vmem:[#allocation15_spill] sm:$0xff] }
 0x111   : > { %v5490_v62 = vadd.f32 %v1260_v33, %v886_v48  ;;  %v901_v45 = vadd.f32 %v3887_v1, %v5364_v50  ;;  %v1270_v10 = vpop.f32.mrf.mxu0  ;;  %4188 = vmatprep.mubr.msk.f32.mxu1 %vm408_vm2, %v6209_v2 }
 0x112   : > { %v895_v51 = vpop.f32.mrf.mxu1 }
 0x113   : > { %v5495_v34 = vadd.f32 %v3937_v14, %v901_v45  ;;  %v896_v55 = vadd.f32 %v895_v51, %v5377_v52  ;;  %v3940_v23 = vpop.f32.mrf.mxu0  ;;  %4239 = vmatmul.mubr.msk.f32.gmra.mxu0 %vm408_vm2, %v6184_v19  ;;  %v6215_v14 = vld [vmem:[#allocation17_spill] sm:$0xff]  ;;  %v6217_v51 = vld [vmem:[#allocation22_spill] sm:$0xff] }
 0x114   : > { %v3890_v5 = vpop.f32.mrf.mxu1  ;;  %4189 = vmatmul.mubr.msk.f32.gmra.mxu1 %vm408_vm2, %v6210_v60  ;;  %4241 = vmatprep.mubr.msk.f32.mxu0 %vm408_vm2, %v4921_v42  ;;  %v6218_v60 = vld [vmem:[#allocation25_spill] sm:$0xff] }
 0x115   : > { %v5504_v26 = vadd.f32 %v1270_v10, %v896_v55  ;;  %v911_v50 = vadd.f32 %v3890_v5, %v5386_v41  ;;  %v1280_v44 = vpop.f32.mrf.mxu0  ;;  %4191 = vmatprep.mubr.msk.f32.mxu1 %vm408_vm2, %v6211_v0  ;;  %v6216_v10 = vld [vmem:[#allocation20_spill] sm:$0xff] }
 0x116   : > { %v905_v52 = vpop.f32.mrf.mxu1 }
 0x117   : > { %v5509_v9 = vadd.f32 %v3940_v23, %v911_v50  ;;  %v906_v19 = vadd.f32 %v905_v52, %v5396_v15  ;;  %v3943_v31 = vpop.f32.mrf.mxu0  ;;  %4242 = vmatmul.mubr.msk.f32.gmra.mxu0 %vm408_vm2, %v6185_v25 }
 0x118   : > { %v3893_v47 = vpop.f32.mrf.mxu1  ;;  %4192 = vmatmul.mubr.msk.f32.gmra.mxu1 %vm408_vm2, %v6212_v29  ;;  %4244 = vmatprep.mubr.msk.f32.mxu0 %vm408_vm2, %v6186_v30  ;;  %v6221_v29 = vld [vmem:[#allocation6_spill] sm:$0xff] }
 0x119   : > { %v5518_v42 = vadd.f32 %v1280_v44, %v906_v19  ;;  %v921_v41 = vadd.f32 %v3893_v47, %v5263_v8  ;;  %v1290_v16 = vpop.f32.mrf.mxu0  ;;  %4194 = vmatprep.mubr.msk.f32.mxu1 %vm408_vm2, %v6213_v53  ;;  %v6219_v44 = vld [vmem:[#allocation27_spill] sm:$0xff]  ;;  %v2481_v53 = vrot.slane %v5356_v36, 1 }
 0x11a   : > { %v915_v15 = vpop.f32.mrf.mxu1 }
 0x11b   : > { %v5523_v3 = vadd.f32 %v3943_v31, %v921_v41  ;;  %v916_v25 = vadd.f32 %v915_v15, %v5273_v35  ;;  %v3946_v33 = vpop.f32.mrf.mxu0  ;;  %4245 = vmatmul.mubr.msk.f32.gmra.mxu0 %vm408_vm2, %v6187_v24  ;;  %v2753_v31 = vrot.slane %v5375_v32, 2  ;;  %v2482_v15 = vrot.slane %v5375_v32, 1  ;;  %v6227_v32 = vld [vmem:[#allocation10_spill] sm:$0xff] }
 0x11c   : > { %v3896_v4 = vpop.f32.mrf.mxu1  ;;  %4195 = vmatmul.mubr.msk.f32.gmra.mxu1 %vm408_vm2, %v6214_v11  ;;  %4247 = vmatprep.mubr.msk.f32.mxu0 %vm408_vm2, %v6188_v40 }
 0x11d   : > { %v5532_v8 = vadd.f32 %v1290_v16, %v916_v25  ;;  %v931_v30 = vadd.f32 %v3896_v4, %v5279_v39  ;;  %v1300_v48 = vpop.f32.mrf.mxu0  ;;  %4197 = vmatprep.mubr.msk.f32.mxu1 %vm408_vm2, %v6215_v14  ;;  %v6222_v16 = vld [vmem:[#allocation31_spill] sm:$0xff]  ;;  %v6225_v14 = vld [vmem:[#allocation33_spill] sm:$0xff] }
 0x11e   : > { %v925_v35 = vpop.f32.mrf.mxu1 }
 0x11f   : > { %v5537_v1 = vadd.f32 %v3946_v33, %v931_v30  ;;  %v926_v24 = vadd.f32 %v925_v35, %v5289_v59  ;;  %v3949_v21 = vpop.f32.mrf.mxu0  ;;  %4248 = vmatmul.mubr.msk.f32.gmra.mxu0 %vm408_vm2, %v6189_v22  ;;  %v6224_v30 = vld [vmem:[#allocation18_spill] sm:$0xff] }
 0x120   : > { %v3899_v45 = vpop.f32.mrf.mxu1  ;;  %4198 = vmatmul.mubr.msk.f32.gmra.mxu1 %vm408_vm2, %v6216_v10  ;;  %4250 = vmatprep.mubr.msk.f32.mxu0 %vm408_vm2, %v4972_v38  ;;  %v6226_v35 = vld [vmem:[#allocation14_spill] sm:$0xff]  ;;  %v6228_v10 = vld [vmem:[#allocation23_spill] sm:$0xff] }
 0x121   : > { %v5546_v39 = vadd.f32 %v1300_v48, %v926_v24  ;;  %v941_v40 = vadd.f32 %v3899_v45, %v5295_v54  ;;  %v1310_v2 = vpop.f32.mrf.mxu0  ;;  %4200 = vmatprep.mubr.msk.f32.mxu1 %vm408_vm2, %v6217_v51 }
 0x122   : > { %v935_v59 = vpop.f32.mrf.mxu1 }
 0x123   : > { %v5551_v55 = vadd.f32 %v3949_v21, %v941_v40  ;;  %v936_v22 = vadd.f32 %v935_v59, %v5305_v7  ;;  %v3952_v23 = vpop.f32.mrf.mxu0  ;;  %4251 = vmatmul.mubr.msk.f32.gmra.mxu0 %vm408_vm2, %v4983_v58  ;;  %v2483_v59 = vsel %vm325_vm1, %v2481_v53, %v2482_v15 }
 0x124   : > { %v3902_v5 = vpop.f32.mrf.mxu1  ;;  %4201 = vmatmul.mubr.msk.f32.gmra.mxu1 %vm408_vm2, %v6218_v60  ;;  %4253 = vmatprep.mubr.msk.f32.mxu0 %vm408_vm2, %v4989_v56  ;;  %v6220_v56 = vld [vmem:[#allocation29_spill] sm:$0xff] }
 0x125   : > { %v5560_v38 = vadd.f32 %v1310_v2, %v936_v22  ;;  %v951_v54 = vadd.f32 %v3902_v5, %v5311_v6  ;;  %v1320_v50 = vpop.f32.mrf.mxu0  ;;  %4203 = vmatprep.mubr.msk.f32.mxu1 %vm408_vm2, %v6219_v44  ;;  %v2752_v6 = vrot.slane %v5356_v36, 2  ;;  %v6231_v44 = vld [vmem:[#allocation4_spill] sm:$0xff] }
 0x126   : > { %v945_v7 = vpop.f32.mrf.mxu1 }
 0x127   : > { %v5565_v0 = vadd.f32 %v3952_v23, %v951_v54  ;;  %v946_v58 = vadd.f32 %v945_v7, %v5321_v18  ;;  %v3955_v52 = vpop.f32.mrf.mxu0  ;;  %4254 = vmatmul.mubr.msk.f32.gmra.mxu0 %vm408_vm2, %v5000_v63  ;;  %v275_v63 = vld [vmem:[%s4375_s25 + $0x1a8] sm:$0x3]  ;;  %v2754_v40 = vsel %vm994_vm3, %v2752_v6, %v2753_v31  ;;  %v6229_v23 = vld [vmem:[#allocation12_spill] sm:$0xff]  ;;  %v6230_v54 = vld [vmem:[#allocation34_spill] sm:$0xff] }
 0x128   : > { %v3905_v19 = vpop.f32.mrf.mxu1  ;;  %4204 = vmatmul.mubr.msk.f32.gmra.mxu1 %vm408_vm2, %v6220_v56  ;;  %4256 = vmatprep.mubr.msk.f32.mxu0 %vm408_vm2, %v5006_v13  ;;  %v6223_v13 = vld [vmem:[#allocation8_spill] sm:$0xff]  ;;  %v2755_v24 = vrot.slane %v275_v63, 2  ;;  %v2484_v2 = vrot.slane %v275_v63, 1 }
 0x129   : > { %v5576_v47 = vadd.f32 %v1320_v50, %v946_v58  ;;  %v961_v41 = vadd.f32 %v3905_v19, %v6221_v29  ;;  %v1330_v18 = vpop.f32.mrf.mxu0  ;;  %4206 = vmatprep.mubr.msk.f32.mxu1 %vm408_vm2, %v6222_v16 }
 0x12a   : > { %v955_v25 = vpop.f32.mrf.mxu1  ;;  %v2756_v7 = vsel %vm994_vm3, %v2753_v31, %v2755_v24  ;;  %v2485_v6 = vsel %vm325_vm1, %v2482_v15, %v2484_v2  ;;  %v6235_v15 = vld [vmem:[#allocation37_spill] sm:$0xff] }
 0x12b   : > { %v5584_v33 = vadd.f32 %v3955_v52, %v961_v41  ;;  %v956_v4 = vadd.f32 %v955_v25, %v6223_v13  ;;  %v3958_v11 = vpop.f32.mrf.mxu0  ;;  %4257 = vmatmul.mubr.msk.f32.gmra.mxu0 %vm408_vm2, %v6224_v30  ;;  %v6232_v52 = vld [vmem:[#allocation19_spill] sm:$0xff]  ;;  %v6234_v25 = vld [vmem:[#allocation36_spill] sm:$0xff] }
 0x12c   : > { %v3908_v48 = vpop.f32.mrf.mxu1  ;;  %4207 = vmatmul.mubr.msk.f32.gmra.mxu1 %vm408_vm2, %v6225_v14  ;;  %4259 = vmatprep.mubr.msk.f32.mxu0 %vm408_vm2, %v6226_v35 }
 0x12d   : > { %v5593_v36 = vadd.f32 %v1330_v18, %v956_v4  ;;  %v971_v21 = vadd.f32 %v3908_v48, %v6227_v32  ;;  %v1340_v45 = vpop.f32.mrf.mxu0  ;;  %4209 = vmatprep.mubr.msk.f32.mxu1 %vm408_vm2, %v6228_v10  ;;  %v6233_v18 = vld [vmem:[#allocation35_spill] sm:$0xff] }
 0x12e   : > { %v965_v51 = vpop.f32.mrf.mxu1 }
 0x12f   : > { %v5600_v22 = vadd.f32 %v3958_v11, %v971_v21  ;;  %v966_v5 = vadd.f32 %v965_v51, %v6229_v23  ;;  %v3961_v60 = vpop.f32.mrf.mxu0  ;;  %4260 = vmatmul.mubr.msk.f32.gmra.mxu0 %vm408_vm2, %v6230_v54 }
 0x130   : > { %v3911_v50 = vpop.f32.mrf.mxu1  ;;  %4210 = vmatmul.mubr.msk.f32.gmra.mxu1 %vm408_vm2, %v6231_v44  ;;  %4262 = vmatprep.mubr.msk.f32.mxu0 %vm408_vm2, %v2754_v40 }
 0x131   : > { %v5609_v58 = vadd.f32 %v1340_v45, %v966_v5  ;;  %v981_v19 = vadd.f32 %v3911_v50, %v6232_v52  ;;  %v1350_v56 = vpop.f32.mrf.mxu0  ;;  %4212 = vmatprep.mubr.msk.f32.mxu1 %vm408_vm2, %v2483_v59 }
 0x132   : > { %v975_v29 = vpop.f32.mrf.mxu1 }
 0x133   : > { %v5614_v41 = vadd.f32 %v3961_v60, %v981_v19  ;;  %v976_v16 = vadd.f32 %v975_v29, %v6233_v18  ;;  %v3964_v63 = vpop.f32.mrf.mxu0  ;;  %4263 = vmatmul.mubr.msk.f32.gmra.mxu0 %vm408_vm2, %v2756_v7 }
 0x134   : > { %v3914_v53 = vpop.f32.mrf.mxu1  ;;  %4213 = vmatmul.mubr.msk.f32.gmra.mxu1 %vm408_vm2, %v2485_v6 }
 0x135   : > { %v5619_v31 = vadd.f32 %v1350_v56, %v976_v16  ;;  %v991_v13 = vadd.f32 %v3914_v53, %v6234_v25  ;;  %v1360_v4 = vpop.f32.mrf.mxu0 }
 0x136   : > { %v985_v11 = vpop.f32.mrf.mxu1 }
 0x137   : > { %v5622_v30 = vadd.f32 %v3964_v63, %v991_v13  ;;  %v986_v48 = vadd.f32 %v985_v11, %v6235_v15  ;;  %v4019_v14 = vpop.f32.mrf.mxu0 }
 0x138   : > { %v3969_v35 = vpop.f32.mrf.mxu1 }
 0x139   : > { %v5625_v24 = vadd.f32 %v1360_v4, %v986_v48  ;;  %v1638_v32 = vadd.f32 %v3969_v35, %v5411_v57  ;;  %v1750_v21 = vpop.f32.mrf.mxu0 }
 0x13a   : > { %v1478_v45 = vpop.f32.mrf.mxu1 }
 0x13b   : > { %v5628_v10 = vadd.f32 %v4019_v14, %v1638_v32  ;;  %v1637_v40 = vadd.f32 %v1478_v45, %v5420_v43  ;;  %v4022_v2 = vpop.f32.mrf.mxu0 }
 0x13c   : > { %v3972_v51 = vpop.f32.mrf.mxu1 }
 0x13d   : > { %v5631_v59 = vadd.f32 %v1750_v21, %v1637_v40  ;;  %v1640_v23 = vadd.f32 %v3972_v51, %v5425_v20  ;;  %v1760_v5 = vpop.f32.mrf.mxu0 }
 0x13e   : > { %v1488_v60 = vpop.f32.mrf.mxu1 }
 0x13f   : > { %v5634_v54 = vadd.f32 %v4022_v2, %v1640_v23  ;;  %v1639_v50 = vadd.f32 %v1488_v60, %v5434_v49  ;;  %v4025_v44 = vpop.f32.mrf.mxu0 }
 0x140   : > { %v3975_v57 = vpop.f32.mrf.mxu1 }
 0x141   : > { %v5637_v7 = vadd.f32 %v1760_v5, %v1639_v50  ;;  %v1642_v52 = vadd.f32 %v3975_v57, %v5439_v27  ;;  %v1770_v19 = vpop.f32.mrf.mxu0 }
 0x142   : > { %v1498_v43 = vpop.f32.mrf.mxu1 }
 0x143   : > { %v5640_v56 = vadd.f32 %v4025_v44, %v1642_v52  ;;  %v1641_v6 = vadd.f32 %v1498_v43, %v5448_v12  ;;  %v4028_v29 = vpop.f32.mrf.mxu0 }
 0x144   : > { %v3978_v20 = vpop.f32.mrf.mxu1 }
 0x145   : > { %v5643_v18 = vadd.f32 %v1770_v19, %v1641_v6  ;;  %v1644_v16 = vadd.f32 %v3978_v20, %v5453_v17  ;;  %v1780_v63 = vpop.f32.mrf.mxu0 }
 0x146   : > { %v1508_v49 = vpop.f32.mrf.mxu1 }
 0x147   : > { %v5646_v53 = vadd.f32 %v4028_v29, %v1644_v16  ;;  %v1643_v25 = vadd.f32 %v1508_v49, %v5462_v37  ;;  %v4031_v13 = vpop.f32.mrf.mxu0 }
 0x148   : > { %v3981_v27 = vpop.f32.mrf.mxu1 }
 0x149   : > { %v5649_v4 = vadd.f32 %v1780_v63, %v1643_v25  ;;  %v1646_v11 = vadd.f32 %v3981_v27, %v5467_v61  ;;  %v1790_v15 = vpop.f32.mrf.mxu0 }
 0x14a   : > { %v1518_v12 = vpop.f32.mrf.mxu1 }
 0x14b   : > { %v5652_v48 = vadd.f32 %v4031_v13, %v1646_v11  ;;  %v1645_v14 = vadd.f32 %v1518_v12, %v5476_v28  ;;  %v4034_v35 = vpop.f32.mrf.mxu0 }
 0x14c   : > { %v3984_v17 = vpop.f32.mrf.mxu1 }
 0x14d   : > { %v5655_v32 = vadd.f32 %v1790_v15, %v1645_v14  ;;  %v1648_v21 = vadd.f32 %v3984_v17, %v5481_v46  ;;  %v1800_v45 = vpop.f32.mrf.mxu0 }
 0x14e   : > { %v1528_v37 = vpop.f32.mrf.mxu1 }
 0x14f   : > { %v5658_v40 = vadd.f32 %v4034_v35, %v1648_v21  ;;  %v1647_v2 = vadd.f32 %v1528_v37, %v5490_v62  ;;  %v4037_v51 = vpop.f32.mrf.mxu0 }
 0x150   : > { %v3987_v61 = vpop.f32.mrf.mxu1 }
 0x151   : > { %v5661_v23 = vadd.f32 %v1800_v45, %v1647_v2  ;;  %v1650_v5 = vadd.f32 %v3987_v61, %v5495_v34  ;;  %v1810_v60 = vpop.f32.mrf.mxu0 }
 0x152   : > { %v1538_v28 = vpop.f32.mrf.mxu1 }
 0x153   : > { %v5664_v50 = vadd.f32 %v4037_v51, %v1650_v5  ;;  %v1649_v44 = vadd.f32 %v1538_v28, %v5504_v26  ;;  %v4040_v57 = vpop.f32.mrf.mxu0 }
 0x154   : > { %v3990_v46 = vpop.f32.mrf.mxu1 }
 0x155   : > { %v5667_v52 = vadd.f32 %v1810_v60, %v1649_v44  ;;  %v1652_v19 = vadd.f32 %v3990_v46, %v5509_v9  ;;  %v1820_v43 = vpop.f32.mrf.mxu0 }
 0x156   : > { %v1548_v62 = vpop.f32.mrf.mxu1 }
 0x157   : > { %v5670_v6 = vadd.f32 %v4040_v57, %v1652_v19  ;;  %v1651_v29 = vadd.f32 %v1548_v62, %v5518_v42  ;;  %v4043_v20 = vpop.f32.mrf.mxu0 }
 0x158   : > { %v3993_v34 = vpop.f32.mrf.mxu1 }
 0x159   : > { %v5673_v16 = vadd.f32 %v1820_v43, %v1651_v29  ;;  %v1654_v63 = vadd.f32 %v3993_v34, %v5523_v3  ;;  %v1830_v49 = vpop.f32.mrf.mxu0 }
 0x15a   : > { %v1558_v26 = vpop.f32.mrf.mxu1 }
 0x15b   : > { %v5676_v25 = vadd.f32 %v4043_v20, %v1654_v63  ;;  %v1653_v13 = vadd.f32 %v1558_v26, %v5532_v8  ;;  %v4046_v27 = vpop.f32.mrf.mxu0 }
 0x15c   : > { %v3996_v9 = vpop.f32.mrf.mxu1 }
 0x15d   : > { %v5679_v11 = vadd.f32 %v1830_v49, %v1653_v13  ;;  %v1656_v15 = vadd.f32 %v3996_v9, %v5537_v1  ;;  %v1840_v12 = vpop.f32.mrf.mxu0 }
 0x15e   : > { %v1568_v42 = vpop.f32.mrf.mxu1 }
 0x15f   : > { %v5682_v14 = vadd.f32 %v4046_v27, %v1656_v15  ;;  %v1655_v35 = vadd.f32 %v1568_v42, %v5546_v39  ;;  %v4049_v17 = vpop.f32.mrf.mxu0 }
 0x160   : > { %v3999_v3 = vpop.f32.mrf.mxu1 }
 0x161   : > { %6236 = vst [vmem:[#allocation38_spill] sm:$0xff] %v5682_v14  ;;  %v5685_v21 = vadd.f32 %v1840_v12, %v1655_v35  ;;  %v1658_v45 = vadd.f32 %v3999_v3, %v5551_v55  ;;  %v1850_v37 = vpop.f32.mrf.mxu0 }
 0x162   : > { %v1578_v8 = vpop.f32.mrf.mxu1 }
 0x163   : > { %6237 = vst [vmem:[#allocation39_spill] sm:$0xff] %v5685_v21  ;;  %v5688_v2 = vadd.f32 %v4049_v17, %v1658_v45  ;;  %v1657_v51 = vadd.f32 %v1578_v8, %v5560_v38  ;;  %v4052_v61 = vpop.f32.mrf.mxu0 }
 0x164   : > { %v4002_v1 = vpop.f32.mrf.mxu1 }
 0x165   : > { %6238 = vst [vmem:[#allocation40_spill] sm:$0xff] %v5688_v2  ;;  %v5691_v5 = vadd.f32 %v1850_v37, %v1657_v51  ;;  %v1660_v60 = vadd.f32 %v4002_v1, %v5565_v0  ;;  %v1860_v28 = vpop.f32.mrf.mxu0 }
 0x166   : > { %v1588_v39 = vpop.f32.mrf.mxu1 }
 0x167   : > { %6239 = vst [vmem:[#allocation41_spill] sm:$0xff] %v5691_v5  ;;  %v5694_v44 = vadd.f32 %v4052_v61, %v1660_v60  ;;  %v1659_v57 = vadd.f32 %v1588_v39, %v5576_v47  ;;  %v4055_v46 = vpop.f32.mrf.mxu0 }
 0x168   : > { %v4005_v55 = vpop.f32.mrf.mxu1 }
 0x169   : > { %6240 = vst [vmem:[#allocation42_spill] sm:$0xff] %v5694_v44  ;;  %v5697_v19 = vadd.f32 %v1860_v28, %v1659_v57  ;;  %v1662_v43 = vadd.f32 %v4005_v55, %v5584_v33  ;;  %v1870_v62 = vpop.f32.mrf.mxu0 }
 0x16a   : > { %v1598_v38 = vpop.f32.mrf.mxu1 }
 0x16b   : > { %6241 = vst [vmem:[#allocation43_spill] sm:$0xff] %v5697_v19  ;;  %v5700_v29 = vadd.f32 %v4055_v46, %v1662_v43  ;;  %v1661_v20 = vadd.f32 %v1598_v38, %v5593_v36  ;;  %v4058_v34 = vpop.f32.mrf.mxu0 }
 0x16c   : > { %v4008_v0 = vpop.f32.mrf.mxu1 }
 0x16d   : > { %6242 = vst [vmem:[#allocation44_spill] sm:$0xff] %v5700_v29  ;;  %v5703_v63 = vadd.f32 %v1870_v62, %v1661_v20  ;;  %v1664_v49 = vadd.f32 %v4008_v0, %v5600_v22  ;;  %v1880_v26 = vpop.f32.mrf.mxu0 }
 0x16e   : > { %v1608_v47 = vpop.f32.mrf.mxu1 }
 0x16f   : > { %6243 = vst [vmem:[#allocation16_spill] sm:$0xff] %v5703_v63  ;;  %v5706_v13 = vadd.f32 %v4058_v34, %v1664_v49  ;;  %v1663_v27 = vadd.f32 %v1608_v47, %v5609_v58  ;;  %v4061_v9 = vpop.f32.mrf.mxu0 }
 0x170   : > { %v4011_v33 = vpop.f32.mrf.mxu1 }
 0x171   : > { %6244 = vst [vmem:[#allocation21_spill] sm:$0xff] %v5706_v13  ;;  %v5709_v15 = vadd.f32 %v1880_v26, %v1663_v27  ;;  %v1666_v12 = vadd.f32 %v4011_v33, %v5614_v41  ;;  %v1890_v42 = vpop.f32.mrf.mxu0 }
 0x172   : > { %v1618_v36 = vpop.f32.mrf.mxu1 }
 0x173   : > { %6245 = vst [vmem:[#allocation24_spill] sm:$0xff] %v5709_v15  ;;  %v5712_v35 = vadd.f32 %v4061_v9, %v1666_v12  ;;  %v1665_v17 = vadd.f32 %v1618_v36, %v5619_v31  ;;  %v4064_v3 = vpop.f32.mrf.mxu0 }
 0x174   : > { %v4014_v22 = vpop.f32.mrf.mxu1 }
 0x175   : > { %6246 = vst [vmem:[#allocation26_spill] sm:$0xff] %v5712_v35  ;;  %v5715_v45 = vadd.f32 %v1890_v42, %v1665_v17  ;;  %v1668_v37 = vadd.f32 %v4014_v22, %v5622_v30  ;;  %v1900_v8 = vpop.f32.mrf.mxu0 }
 0x176   : > { %v1628_v58 = vpop.f32.mrf.mxu1 }
 0x177   : > { %6247 = vst [vmem:[#allocation28_spill] sm:$0xff] %v5715_v45  ;;  %v5718_v51 = vadd.f32 %v4064_v3, %v1668_v37  ;;  %v1667_v61 = vadd.f32 %v1628_v58, %v5625_v24  ;;  %v5721_v1 = vpop.f32.mrf.mxu0 }
 0x178   : > { %v4069_v41 = vpop.f32.mrf.mxu1 }
 0x179   : > { %6248 = vst [vmem:[#allocation30_spill] sm:$0xff] %v5718_v51  ;;  %v5723_v60 = vadd.f32 %v1900_v8, %v1667_v61  ;;  %v5725_v28 = vpop.f32.mrf.mxu0 }
 0x17a   : > { %v2021_v31 = vpop.f32.mrf.mxu1 }
 0x17b   : > { %6249 = vst [vmem:[#allocation32_spill] sm:$0xff] %v5723_v60  ;;  %v5727_v39 = vpop.f32.mrf.mxu0 }
 0x17c   : > { %v4072_v57 = vpop.f32.mrf.mxu1 }
 0x17d   : > { %v5729_v46 = vpop.f32.mrf.mxu0 }
 0x17e   : > { %v5731_v30 = vpop.f32.mrf.mxu1 }
 0x17f   : > { %v5733_v55 = vpop.f32.mrf.mxu0 }
 0x180   : > { %v5735_v43 = vpop.f32.mrf.mxu1 }
 0x181   : > { %v5737_v24 = vpop.f32.mrf.mxu0 }
 0x182   : > { %v5739_v62 = vpop.f32.mrf.mxu1 }
 0x183   : > { %v5741_v38 = vpop.f32.mrf.mxu0 }
 0x184   : > { %v5743_v20 = vpop.f32.mrf.mxu1 }
 0x185   : > { %v5745_v34 = vpop.f32.mrf.mxu0 }
 0x186   : > { %v5747_v0 = vpop.f32.mrf.mxu1 }
 0x187   : > { %v5749_v49 = vpop.f32.mrf.mxu0 }
 0x188   : > { %v5751_v26 = vpop.f32.mrf.mxu1 }
 0x189   : > { %v5753_v47 = vpop.f32.mrf.mxu0 }
 0x18a   : > { %v5755_v27 = vpop.f32.mrf.mxu1 }
 0x18b   : > { %v5757_v9 = vpop.f32.mrf.mxu0 }
 0x18c   : > { %v5759_v33 = vpop.f32.mrf.mxu1 }
 0x18d   : > { %v5761_v12 = vpop.f32.mrf.mxu0 }
 0x18e   : > { %v5763_v42 = vpop.f32.mrf.mxu1 }
 0x18f   : > { %v5765_v36 = vpop.f32.mrf.mxu0 }
 0x190   : > { %v5767_v17 = vpop.f32.mrf.mxu1 }
 0x191   : > { %v5769_v3 = vpop.f32.mrf.mxu0 }
 0x192   : > { %v5771_v22 = vpop.f32.mrf.mxu1 }
 0x193   : > { %v5773_v37 = vpop.f32.mrf.mxu0 }
 0x194   : > { %v5775_v8 = vpop.f32.mrf.mxu1 }
 0x195   : > { %v5777_v58 = vpop.f32.mrf.mxu0 }
 0x196   : > { %v5779_v61 = vpop.f32.mrf.mxu1 }
 0x197   : > { %v5781_v60 = vpop.f32.mrf.mxu0 }
 0x198   : > { %v5783_v51 = vpop.f32.mrf.mxu1 }
 0x199   : > { %v5785_v45 = vpop.f32.mrf.mxu0 }
 0x19a   : > { %6250 = vst [vmem:[#allocation2_spill] sm:$0xff] %v5785_v45  ;;  %v5787_v35 = vpop.f32.mrf.mxu1 }
 0x19b   : > { %v5789_v15 = vpop.f32.mrf.mxu0 }
 0x19c   : > { %6251 = vst [vmem:[#allocation3_spill] sm:$0xff] %v5789_v15  ;;  %v5791_v13 = vpop.f32.mrf.mxu1 }
 0x19d   : > { %6252 = vst [vmem:[#allocation5_spill] sm:$0xff] %v5791_v13  ;;  %v5793_v63 = vpop.f32.mrf.mxu0 }
 0x19e   : > { %6253 = vst [vmem:[#allocation7_spill] sm:$0xff] %v5793_v63  ;;  %v5795_v29 = vpop.f32.mrf.mxu1 }
 0x19f   : > { %6254 = vst [vmem:[#allocation9_spill] sm:$0xff] %v5795_v29  ;;  %v5797_v19 = vpop.f32.mrf.mxu0 }
 0x1a0   : > { %6255 = vst [vmem:[#allocation11_spill] sm:$0xff] %v5797_v19  ;;  %v5799_v44 = vpop.f32.mrf.mxu1 }
 0x1a1   : > { %6256 = vst [vmem:[#allocation13_spill] sm:$0xff] %v5799_v44  ;;  %v5801_v5 = vpop.f32.mrf.mxu0 }
 0x1a2   : > { %6257 = vst [vmem:[#allocation15_spill] sm:$0xff] %v5801_v5  ;;  %v5803_v2 = vpop.f32.mrf.mxu1 }
 0x1a3   : > { %6258 = vst [vmem:[#allocation17_spill] sm:$0xff] %v5803_v2  ;;  %v5805_v21 = vpop.f32.mrf.mxu0 }
 0x1a4   : > { %6259 = vst [vmem:[#allocation20_spill] sm:$0xff] %v5805_v21  ;;  %v5807_v45 = vpop.f32.mrf.mxu1 }
 0x1a5   : > { %6260 = vst [vmem:[#allocation22_spill] sm:$0xff] %v5807_v45  ;;  %v5809_v14 = vpop.f32.mrf.mxu0 }
 0x1a6   : > { %6261 = vst [vmem:[#allocation25_spill] sm:$0xff] %v5809_v14  ;;  %v5811_v15 = vpop.f32.mrf.mxu1 }
 0x1a7   : > { %6262 = vst [vmem:[#allocation27_spill] sm:$0xff] %v5811_v15  ;;  %v5813_v13 = vpop.f32.mrf.mxu0 }
 0x1a8   : > { %6263 = vst [vmem:[#allocation29_spill] sm:$0xff] %v5813_v13  ;;  %v5815_v63 = vpop.f32.mrf.mxu1 }
 0x1a9   : > { %6264 = vst [vmem:[#allocation6_spill] sm:$0xff] %v5815_v63  ;;  %v5817_v29 = vpop.f32.mrf.mxu0 }
 0x1aa   : > { %6265 = vst [vmem:[#allocation31_spill] sm:$0xff] %v5817_v29  ;;  %v5819_v19 = vpop.f32.mrf.mxu1  ;;  %v2181_v29 = vadd.f32 %v4069_v41, %v5628_v10  ;;  %v2182_v10 = vadd.f32 %v5731_v30, %v5637_v7  ;;  %v2184_v7 = vadd.f32 %v5739_v62, %v5643_v18  ;;  %v2187_v18 = vadd.f32 %v5743_v20, %v5646_v53 }
 0x1ab   : > { %6266 = vst [vmem:[#allocation8_spill] sm:$0xff] %v5819_v19  ;;  %v5821_v44 = vpop.f32.mrf.mxu0  ;;  %v2189_v20 = vadd.f32 %v5751_v26, %v5652_v48 }
 0x1ac   : > { %6267 = vst [vmem:[#allocation18_spill] sm:$0xff] %v5821_v44  ;;  %v5823_v5 = vpop.f32.mrf.mxu1 }
 0x1ad   : > { %6268 = vst [vmem:[#allocation33_spill] sm:$0xff] %v5823_v5  ;;  %v5825_v2 = vpop.f32.mrf.mxu0  ;;  %v2180_v5 = vadd.f32 %v2021_v31, %v5631_v59  ;;  %v2185_v59 = vadd.f32 %v5735_v43, %v5640_v56  ;;  %v5858_v31 = vld [vmem:[%s6024_s2] ss:$0 sm:$0xff] }
 0x1ae   : > { %6269 = vst [vmem:[#allocation14_spill] sm:$0xff] %v5825_v2  ;;  %v5827_v21 = vpop.f32.mrf.mxu1 }
 0x1af   : > { %6270 = vst [vmem:[#allocation10_spill] sm:$0xff] %v5827_v21  ;;  %v5829_v45 = vpop.f32.mrf.mxu0 }
 0x1b0   : > { %6271 = vst [vmem:[#allocation23_spill] sm:$0xff] %v5829_v45  ;;  %v5831_v14 = vpop.f32.mrf.mxu1  ;;  %v2449_v45 = vadd.f32 %v5721_v1, %v2181_v29 }
 0x1b1   : > { %6272 = vst [vmem:[#allocation12_spill] sm:$0xff] %v5831_v14  ;;  %v5833_v13 = vpop.f32.mrf.mxu0  ;;  %v2183_v14 = vadd.f32 %v4072_v57, %v5634_v54 }
 0x1b2   : > { %6273 = vst [vmem:[#allocation34_spill] sm:$0xff] %v5833_v13  ;;  %v5835_v63 = vpop.f32.mrf.mxu1 }
 0x1b3   : > { %6274 = vst [vmem:[#allocation4_spill] sm:$0xff] %v5835_v63  ;;  %v5838_v19 = vpop.f32.mrf.mxu0  ;;  %v2448_v63 = vadd.f32 %v5725_v28, %v2180_v5  ;;  %v2451_v54 = vadd.f32 %v5727_v39, %v2183_v14 }
 0x1b4   : > { %6275 = vst [vmem:[#allocation19_spill] sm:$0xff] %v5838_v19  ;;  %v5840_v44 = vpop.f32.mrf.mxu1 }
 0x1b5   : > { %v5843_v2 = vpop.f32.mrf.mxu0 }
 0x1b6   : > { %v5845_v21 = vpop.f32.mrf.mxu1 }
 0x1b7   : > { %v4219_v15 = vpop.f32.mrf.mxu0 }
 0x1b8   : > { %v4169_v13 = vpop.f32.mrf.mxu1 }
 0x1b9   : > { %v2721_v41 = vadd.f32 %v4169_v13, %v2449_v45  ;;  %v2832_v19 = vpop.f32.mrf.mxu0  ;;  %v2450_v13 = vadd.f32 %v5729_v46, %v2182_v10  ;;  %v2452_v46 = vadd.f32 %v5737_v24, %v2184_v7 }
 0x1ba   : > { %v2561_v29 = vpop.f32.mrf.mxu1 }
 0x1bb   : > { %v2992_v1 = vadd.f32 %v4219_v15, %v2721_v41  ;;  %v2720_v57 = vadd.f32 %v2561_v29, %v2448_v63  ;;  %v4222_v5 = vpop.f32.mrf.mxu0  ;;  %v2453_v63 = vadd.f32 %v5733_v55, %v2185_v59 }
 0x1bc   : > { %v4172_v56 = vpop.f32.mrf.mxu1 }
 0x1bd   : > { %v3031_v45 = vadd.f32 %v5858_v31, %v2992_v1  ;;  %v2991_v28 = vadd.f32 %v2832_v19, %v2720_v57  ;;  %v2723_v14 = vadd.f32 %v4172_v56, %v2451_v54  ;;  %v2842_v15 = vpop.f32.mrf.mxu0  ;;  %v2186_v19 = vadd.f32 %v5747_v0, %v5649_v4 }
 0x1be   : > { %v2571_v39 = vpop.f32.mrf.mxu1  ;;  %v2455_v1 = vadd.f32 %v5741_v38, %v2187_v18  ;;  %v2188_v0 = vadd.f32 %v5755_v27, %v5655_v32  ;;  %v2190_v18 = vadd.f32 %v5763_v42, %v5661_v23  ;;  %v2192_v42 = vadd.f32 %v5771_v22, %v5667_v52 }
 0x1bf   : > { %3063 = vst [vmem:[%s5866_s19 + $0x8] sm:$0xff] %v3031_v45  ;;  %v3030_v30 = vadd.f32 %v5858_v31, %v2991_v28  ;;  %v2994_v43 = vadd.f32 %v4222_v5, %v2723_v14  ;;  %v2722_v62 = vadd.f32 %v2571_v39, %v2450_v13  ;;  %v4225_v41 = vpop.f32.mrf.mxu0  ;;  %v2454_v56 = vadd.f32 %v5745_v34, %v2186_v19 }
 0x1c0   : > { %v4175_v10 = vpop.f32.mrf.mxu1  ;;  %v2457_v45 = vadd.f32 %v5749_v49, %v2189_v20  ;;  %v2191_v14 = vadd.f32 %v5759_v33, %v5658_v40  ;;  %v2193_v33 = vadd.f32 %v5767_v17, %v5664_v50  ;;  %v2195_v20 = vadd.f32 %v5775_v8, %v5670_v6 }
 0x1c1   : > { %3062 = vst [vmem:[%s5866_s19] sm:$0xff] %v3030_v30  ;;  %v3033_v55 = vadd.f32 %v5858_v31, %v2994_v43  ;;  %v2993_v59 = vadd.f32 %v2842_v15, %v2722_v62  ;;  %v2725_v29 = vadd.f32 %v4175_v10, %v2453_v63  ;;  %v2852_v53 = vpop.f32.mrf.mxu0  ;;  %v2456_v63 = vadd.f32 %v5753_v47, %v2188_v0 }
 0x1c2   : > { %v2581_v54 = vpop.f32.mrf.mxu1  ;;  %v2197_v8 = vadd.f32 %v5783_v51, %v5676_v25 }
 0x1c3   : > { %3065 = vst [vmem:[%s5866_s19 + $0x18] sm:$0xff] %v3033_v55  ;;  %v3032_v24 = vadd.f32 %v5858_v31, %v2993_v59  ;;  %v2996_v57 = vadd.f32 %v4225_v41, %v2725_v29  ;;  %v2724_v5 = vadd.f32 %v2581_v54, %v2452_v46  ;;  %v4228_v4 = vpop.f32.mrf.mxu0  ;;  %v2459_v41 = vadd.f32 %v5757_v9, %v2191_v14  ;;  %v6276_v14 = vld [vmem:[#allocation38_spill] sm:$0xff] }
 0x1c4   : > { %v4178_v7 = vpop.f32.mrf.mxu1  ;;  %v2458_v55 = vadd.f32 %v5761_v12, %v2190_v18  ;;  %v2461_v29 = vadd.f32 %v5765_v36, %v2193_v33  ;;  %v6279_v18 = vld [vmem:[#allocation39_spill] sm:$0xff] }
 0x1c5   : > { %3064 = vst [vmem:[%s5866_s19 + $0x10] sm:$0xff] %v3032_v24  ;;  %v3035_v48 = vadd.f32 %v5858_v31, %v2996_v57  ;;  %v2995_v26 = vadd.f32 %v2852_v53, %v2724_v5  ;;  %v2727_v13 = vadd.f32 %v4178_v7, %v2455_v1  ;;  %v2862_v38 = vpop.f32.mrf.mxu0  ;;  %v2460_v1 = vadd.f32 %v5769_v3, %v2192_v42 }
 0x1c6   : > { %v2591_v28 = vpop.f32.mrf.mxu1  ;;  %v2194_v57 = vadd.f32 %v5779_v61, %v5673_v16  ;;  %v2463_v7 = vadd.f32 %v5773_v37, %v2195_v20  ;;  %v2196_v61 = vadd.f32 %v5787_v35, %v5679_v11 }
 0x1c7   : > { %3067 = vst [vmem:[%s5866_s19 + $0x28] sm:$0xff] %v3035_v48  ;;  %v3034_v32 = vadd.f32 %v5858_v31, %v2995_v26  ;;  %v2998_v27 = vadd.f32 %v4228_v4, %v2727_v13  ;;  %v2726_v15 = vadd.f32 %v2591_v28, %v2454_v56  ;;  %v4231_v34 = vpop.f32.mrf.mxu0 }
 0x1c8   : > { %v4181_v39 = vpop.f32.mrf.mxu1  ;;  %v2462_v13 = vadd.f32 %v5777_v58, %v2194_v57 }
 0x1c9   : > { %3066 = vst [vmem:[%s5866_s19 + $0x20] sm:$0xff] %v3034_v32  ;;  %v3037_v49 = vadd.f32 %v5858_v31, %v2998_v27  ;;  %v2997_v30 = vadd.f32 %v2862_v38, %v2726_v15  ;;  %v2729_v43 = vadd.f32 %v4181_v39, %v2457_v45  ;;  %v2872_v40 = vpop.f32.mrf.mxu0  ;;  %v2465_v45 = vadd.f32 %v5781_v60, %v2197_v8  ;;  %v6277_v32 = vld [vmem:[#allocation5_spill] sm:$0xff] }
 0x1ca   : > { %v2601_v62 = vpop.f32.mrf.mxu1  ;;  %v2199_v27 = vadd.f32 %v6277_v32, %v6276_v14  ;;  %v6295_v32 = vld [vmem:[#allocation20_spill] sm:$0xff] }
 0x1cb   : > { %3069 = vst [vmem:[%s5866_s19 + $0x38] sm:$0xff] %v3037_v49  ;;  %v3036_v47 = vadd.f32 %v5858_v31, %v2997_v30  ;;  %v3000_v46 = vadd.f32 %v4231_v34, %v2729_v43  ;;  %v2728_v10 = vadd.f32 %v2601_v62, %v2456_v63  ;;  %v4234_v23 = vpop.f32.mrf.mxu0  ;;  %v6278_v34 = vld [vmem:[#allocation2_spill] sm:$0xff]  ;;  %v6280_v49 = vld [vmem:[#allocation9_spill] sm:$0xff]  ;;  %v6281_v62 = vld [vmem:[#allocation40_spill] sm:$0xff] }
 0x1cc   : > { %v4184_v19 = vpop.f32.mrf.mxu1  ;;  %v2464_v63 = vadd.f32 %v6278_v34, %v2196_v61  ;;  %v2198_v30 = vadd.f32 %v6280_v49, %v6279_v18  ;;  %v6292_v61 = vld [vmem:[#allocation27_spill] sm:$0xff]  ;;  %v6296_v34 = vld [vmem:[#allocation16_spill] sm:$0xff]  ;;  %v6298_v49 = vld [vmem:[#allocation25_spill] sm:$0xff] }
 0x1cd   : > { %3068 = vst [vmem:[%s5866_s19 + $0x30] sm:$0xff] %v3036_v47  ;;  %v3039_v50 = vadd.f32 %v5858_v31, %v3000_v46  ;;  %v2999_v17 = vadd.f32 %v2872_v40, %v2728_v10  ;;  %v2731_v59 = vadd.f32 %v4184_v19, %v2459_v41  ;;  %v2882_v9 = vpop.f32.mrf.mxu0  ;;  %v6282_v41 = vld [vmem:[#allocation13_spill] sm:$0xff]  ;;  %v6283_v10 = vld [vmem:[#allocation3_spill] sm:$0xff] }
 0x1ce   : > { %v2611_v53 = vpop.f32.mrf.mxu1  ;;  %v2201_v47 = vadd.f32 %v6282_v41, %v6281_v62  ;;  %v6299_v62 = vld [vmem:[#allocation29_spill] sm:$0xff] }
 0x1cf   : > { %3071 = vst [vmem:[%s5866_s19 + $0x48] sm:$0xff] %v3039_v50  ;;  %v3038_v52 = vadd.f32 %v5858_v31, %v2999_v17  ;;  %v3002_v22 = vadd.f32 %v4234_v23, %v2731_v59  ;;  %v2730_v54 = vadd.f32 %v2611_v53, %v2458_v55  ;;  %v4237_v12 = vpop.f32.mrf.mxu0  ;;  %v2467_v23 = vadd.f32 %v6283_v10, %v2199_v27  ;;  %v6284_v17 = vld [vmem:[#allocation41_spill] sm:$0xff]  ;;  %v6286_v53 = vld [vmem:[#allocation7_spill] sm:$0xff] }
 0x1d0   : > { %v4187_v24 = vpop.f32.mrf.mxu1  ;;  %v6285_v59 = vld [vmem:[#allocation17_spill] sm:$0xff]  ;;  %v2466_v20 = vadd.f32 %v6286_v53, %v2198_v30  ;;  %v6304_v53 = vld [vmem:[#allocation10_spill] sm:$0xff] }
 0x1d1   : > { %3070 = vst [vmem:[%s5866_s19 + $0x40] sm:$0xff] %v3038_v52  ;;  %v3041_v36 = vadd.f32 %v5858_v31, %v3002_v22  ;;  %v3001_v5 = vadd.f32 %v2882_v9, %v2730_v54  ;;  %v2733_v4 = vadd.f32 %v4187_v24, %v2461_v29  ;;  %v2892_v6 = vpop.f32.mrf.mxu0  ;;  %v2200_v9 = vadd.f32 %v6285_v59, %v6284_v17  ;;  %v6301_v10 = vld [vmem:[#allocation33_spill] sm:$0xff]  ;;  %v6302_v17 = vld [vmem:[#allocation31_spill] sm:$0xff] }
 0x1d2   : > { %v2621_v0 = vpop.f32.mrf.mxu1 }
 0x1d3   : > { %3073 = vst [vmem:[%s5866_s19 + $0x58] sm:$0xff] %v3041_v36  ;;  %v3040_v3 = vadd.f32 %v5858_v31, %v3001_v5  ;;  %v3004_v56 = vadd.f32 %v4237_v12, %v2733_v4  ;;  %v2732_v48 = vadd.f32 %v2621_v0, %v2460_v1  ;;  %v4240_v16 = vpop.f32.mrf.mxu0  ;;  %v6287_v1 = vld [vmem:[#allocation11_spill] sm:$0xff]  ;;  %v6288_v36 = vld [vmem:[#allocation42_spill] sm:$0xff] }
 0x1d4   : > { %v4190_v26 = vpop.f32.mrf.mxu1  ;;  %v2469_v24 = vadd.f32 %v6287_v1, %v2201_v47  ;;  %v6289_v5 = vld [vmem:[#allocation22_spill] sm:$0xff] }
 0x1d5   : > { %3072 = vst [vmem:[%s5866_s19 + $0x50] sm:$0xff] %v3040_v3  ;;  %v3043_v25 = vadd.f32 %v5858_v31, %v3004_v56  ;;  %v3003_v51 = vadd.f32 %v2892_v6, %v2732_v48  ;;  %v2735_v38 = vadd.f32 %v4190_v26, %v2463_v7  ;;  %v2902_v37 = vpop.f32.mrf.mxu0  ;;  %v2203_v4 = vadd.f32 %v6289_v5, %v6288_v36  ;;  %v6290_v3 = vld [vmem:[#allocation15_spill] sm:$0xff]  ;;  %v6305_v1 = vld [vmem:[#allocation26_spill] sm:$0xff] }
 0x1d6   : > { %v2631_v28 = vpop.f32.mrf.mxu1  ;;  %v2468_v56 = vadd.f32 %v6290_v3, %v2200_v9  ;;  %v6307_v5 = vld [vmem:[#allocation18_spill] sm:$0xff]  ;;  %v6308_v3 = vld [vmem:[#allocation28_spill] sm:$0xff] }
 0x1d7   : > { %3075 = vst [vmem:[%s5866_s19 + $0x68] sm:$0xff] %v3043_v25  ;;  %v3042_v11 = vadd.f32 %v5858_v31, %v3003_v51  ;;  %v3006_v35 = vadd.f32 %v4240_v16, %v2735_v38  ;;  %v2734_v15 = vadd.f32 %v2631_v28, %v2462_v13  ;;  %v4243_v58 = vpop.f32.mrf.mxu0  ;;  %v6291_v16 = vld [vmem:[#allocation43_spill] sm:$0xff]  ;;  %v2471_v27 = vadd.f32 %v6295_v32, %v2203_v4 }
 0x1d8   : > { %v4193_v39 = vpop.f32.mrf.mxu1  ;;  %v2202_v26 = vadd.f32 %v6292_v61, %v6291_v16  ;;  %v6310_v61 = vld [vmem:[#allocation14_spill] sm:$0xff] }
 0x1d9   : > { %3074 = vst [vmem:[%s5866_s19 + $0x60] sm:$0xff] %v3042_v11  ;;  %v3045_v60 = vadd.f32 %v5858_v31, %v3006_v35  ;;  %v3005_v43 = vadd.f32 %v2902_v37, %v2734_v15  ;;  %v2737_v40 = vadd.f32 %v4193_v39, %v2465_v45  ;;  %v2912_v33 = vpop.f32.mrf.mxu0  ;;  %v6293_v37 = vld [vmem:[#allocation44_spill] sm:$0xff]  ;;  %v6294_v45 = vld [vmem:[#allocation6_spill] sm:$0xff] }
 0x1da   : > { %v2641_v46 = vpop.f32.mrf.mxu1  ;;  %v2205_v28 = vadd.f32 %v6294_v45, %v6293_v37  ;;  %v2470_v30 = vadd.f32 %v6298_v49, %v2202_v26  ;;  %v6311_v37 = vld [vmem:[#allocation23_spill] sm:$0xff] }
 0x1db   : > { %3077 = vst [vmem:[%s5866_s19 + $0x78] sm:$0xff] %v3045_v60  ;;  %v3044_v42 = vadd.f32 %v5858_v31, %v3005_v43  ;;  %v3008_v19 = vadd.f32 %v4243_v58, %v2737_v40  ;;  %v2736_v55 = vadd.f32 %v2641_v46, %v2464_v63  ;;  %v4246_v50 = vpop.f32.mrf.mxu0  ;;  %v6297_v63 = vld [vmem:[#allocation8_spill] sm:$0xff]  ;;  %v6300_v46 = vld [vmem:[#allocation21_spill] sm:$0xff] }
 0x1dc   : > { %v4196_v29 = vpop.f32.mrf.mxu1  ;;  %v2204_v39 = vadd.f32 %v6297_v63, %v6296_v34  ;;  %v2473_v41 = vadd.f32 %v6299_v62, %v2205_v28 }
 0x1dd   : > { %3076 = vst [vmem:[%s5866_s19 + $0x70] sm:$0xff] %v3044_v42  ;;  %v3047_v52 = vadd.f32 %v5858_v31, %v3008_v19  ;;  %v3007_v22 = vadd.f32 %v2912_v33, %v2736_v55  ;;  %v2739_v54 = vadd.f32 %v4196_v29, %v2467_v23  ;;  %v2922_v12 = vpop.f32.mrf.mxu0  ;;  %v2207_v23 = vadd.f32 %v6301_v10, %v6300_v46  ;;  %v6303_v29 = vld [vmem:[#allocation24_spill] sm:$0xff] }
 0x1de   : > { %v2651_v57 = vpop.f32.mrf.mxu1  ;;  %v2472_v59 = vadd.f32 %v6302_v17, %v2204_v39  ;;  %v6314_v39 = vld [vmem:[#allocation32_spill] sm:$0xff] }
 0x1df   : > { %3079 = vst [vmem:[%s5866_s19 + $0x88] sm:$0xff] %v3047_v52  ;;  %v3046_v6 = vadd.f32 %v5858_v31, %v3007_v22  ;;  %v3010_v8 = vadd.f32 %v4246_v50, %v2739_v54  ;;  %v2738_v0 = vadd.f32 %v2651_v57, %v2466_v20  ;;  %v4249_v7 = vpop.f32.mrf.mxu0  ;;  %v2206_v20 = vadd.f32 %v6304_v53, %v6303_v29 }
 0x1e0   : > { %v4199_v48 = vpop.f32.mrf.mxu1  ;;  %v2475_v4 = vadd.f32 %v6307_v5, %v2207_v23 }
 0x1e1   : > { %3078 = vst [vmem:[%s5866_s19 + $0x80] sm:$0xff] %v3046_v6  ;;  %v3049_v13 = vadd.f32 %v5858_v31, %v3010_v8  ;;  %v3009_v25 = vadd.f32 %v2922_v12, %v2738_v0  ;;  %v2741_v51 = vadd.f32 %v4199_v48, %v2469_v24  ;;  %v2932_v38 = vpop.f32.mrf.mxu0  ;;  %v6306_v24 = vld [vmem:[#allocation12_spill] sm:$0xff]  ;;  %v2474_v26 = vadd.f32 %v6310_v61, %v2206_v20 }
 0x1e2   : > { %v2661_v14 = vpop.f32.mrf.mxu1  ;;  %v2209_v57 = vadd.f32 %v6306_v24, %v6305_v1 }
 0x1e3   : > { %3081 = vst [vmem:[%s5866_s19 + $0x98] sm:$0xff] %v3049_v13  ;;  %v3048_v11 = vadd.f32 %v5858_v31, %v3009_v25  ;;  %v3012_v35 = vadd.f32 %v4249_v7, %v2741_v51  ;;  %v2740_v15 = vadd.f32 %v2661_v14, %v2468_v56  ;;  %v4252_v58 = vpop.f32.mrf.mxu0  ;;  %v6309_v56 = vld [vmem:[#allocation4_spill] sm:$0xff]  ;;  %v6312_v14 = vld [vmem:[#allocation30_spill] sm:$0xff] }
 0x1e4   : > { %v4202_v18 = vpop.f32.mrf.mxu1  ;;  %v2208_v48 = vadd.f32 %v6309_v56, %v6308_v3  ;;  %v2477_v45 = vadd.f32 %v6311_v37, %v2209_v57  ;;  %v2211_v32 = vadd.f32 %v5840_v44, %v6312_v14 }
 0x1e5   : > { %3080 = vst [vmem:[%s5866_s19 + $0x90] sm:$0xff] %v3048_v11  ;;  %v3051_v60 = vadd.f32 %v5858_v31, %v3012_v35  ;;  %v3011_v43 = vadd.f32 %v2932_v38, %v2740_v15  ;;  %v2743_v40 = vadd.f32 %v4202_v18, %v2471_v27  ;;  %v2942_v33 = vpop.f32.mrf.mxu0  ;;  %v2210_v18 = vadd.f32 %v5845_v21, %v6314_v39 }
 0x1e6   : > { %v2671_v47 = vpop.f32.mrf.mxu1 }
 0x1e7   : > { %3083 = vst [vmem:[%s5866_s19 + $0xa8] sm:$0xff] %v3051_v60  ;;  %v3050_v42 = vadd.f32 %v5858_v31, %v3011_v43  ;;  %v3014_v19 = vadd.f32 %v4252_v58, %v2743_v40  ;;  %v2742_v55 = vadd.f32 %v2671_v47, %v2470_v30  ;;  %v4255_v50 = vpop.f32.mrf.mxu0  ;;  %v6313_v58 = vld [vmem:[#allocation34_spill] sm:$0xff]  ;;  %v6315_v40 = vld [vmem:[#allocation19_spill] sm:$0xff]  ;;  %v2478_v21 = vadd.f32 %v5843_v2, %v2210_v18 }
 0x1e8   : > { %v4205_v9 = vpop.f32.mrf.mxu1  ;;  %v2476_v34 = vadd.f32 %v6313_v58, %v2208_v48 }
 0x1e9   : > { %3082 = vst [vmem:[%s5866_s19 + $0xa0] sm:$0xff] %v3050_v42  ;;  %v3053_v52 = vadd.f32 %v5858_v31, %v3014_v19  ;;  %v3013_v22 = vadd.f32 %v2942_v33, %v2742_v55  ;;  %v2745_v54 = vadd.f32 %v4205_v9, %v2473_v41  ;;  %v2952_v12 = vpop.f32.mrf.mxu0  ;;  %v2479_v33 = vadd.f32 %v6315_v40, %v2211_v32 }
 0x1ea   : > { %v2681_v36 = vpop.f32.mrf.mxu1 }
 0x1eb   : > { %3085 = vst [vmem:[%s5866_s19 + $0xb8] sm:$0xff] %v3053_v52  ;;  %v3052_v6 = vadd.f32 %v5858_v31, %v3013_v22  ;;  %v3016_v8 = vadd.f32 %v4255_v50, %v2745_v54  ;;  %v2744_v0 = vadd.f32 %v2681_v36, %v2472_v59  ;;  %v4258_v7 = vpop.f32.mrf.mxu0 }
 0x1ec   : > { %v4208_v16 = vpop.f32.mrf.mxu1 }
 0x1ed   : > { %3084 = vst [vmem:[%s5866_s19 + $0xb0] sm:$0xff] %v3052_v6  ;;  %v3055_v13 = vadd.f32 %v5858_v31, %v3016_v8  ;;  %v3015_v25 = vadd.f32 %v2952_v12, %v2744_v0  ;;  %v2747_v51 = vadd.f32 %v4208_v16, %v2475_v4  ;;  %v2962_v38 = vpop.f32.mrf.mxu0 }
 0x1ee   : > { %v2691_v28 = vpop.f32.mrf.mxu1 }
 0x1ef   : > { %3087 = vst [vmem:[%s5866_s19 + $0xc8] sm:$0xff] %v3055_v13  ;;  %v3054_v27 = vadd.f32 %v5858_v31, %v3015_v25  ;;  %v3018_v11 = vadd.f32 %v4258_v7, %v2747_v51  ;;  %v2746_v35 = vadd.f32 %v2691_v28, %v2474_v26  ;;  %v4261_v15 = vpop.f32.mrf.mxu0 }
 0x1f0   : > { %v4211_v63 = vpop.f32.mrf.mxu1 }
 0x1f1   : > { %3086 = vst [vmem:[%s5866_s19 + $0xc0] sm:$0xff] %v3054_v27  ;;  %v3057_v49 = vadd.f32 %v5858_v31, %v3018_v11  ;;  %v3017_v30 = vadd.f32 %v2962_v38, %v2746_v35  ;;  %v2749_v60 = vadd.f32 %v4211_v63, %v2477_v45  ;;  %v2972_v44 = vpop.f32.mrf.mxu0 }
 0x1f2   : > { %v2701_v43 = vpop.f32.mrf.mxu1 }
 0x1f3   : > { %3089 = vst [vmem:[%s5866_s19 + $0xd8] sm:$0xff] %v3057_v49  ;;  %v3056_v62 = vadd.f32 %v5858_v31, %v3017_v30  ;;  %v3020_v41 = vadd.f32 %v4261_v15, %v2749_v60  ;;  %v2748_v47 = vadd.f32 %v2701_v43, %v2476_v34  ;;  %v4264_v10 = vpop.f32.mrf.mxu0 }
 0x1f4   : > { %v4214_v46 = vpop.f32.mrf.mxu1 }
 0x1f5   : > { %3088 = vst [vmem:[%s5866_s19 + $0xd0] sm:$0xff] %v3056_v62  ;;  %v3059_v23 = vadd.f32 %v5858_v31, %v3020_v41  ;;  %v3019_v42 = vadd.f32 %v2972_v44, %v2748_v47  ;;  %v2751_v19 = vadd.f32 %v4214_v46, %v2479_v33  ;;  %v2982_v9 = vpop.f32.mrf.mxu0 }
 0x1f6   : > { %v2711_v55 = vpop.f32.mrf.mxu1 }
 0x1f7   : > { %3091 = vst [vmem:[%s5866_s19 + $0xe8] sm:$0xff] %v3059_v23  ;;  %v3058_v50 = vadd.f32 %v5858_v31, %v3019_v42  ;;  %v3022_v17 = vadd.f32 %v4264_v10, %v2751_v19  ;;  %v2750_v59 = vadd.f32 %v2711_v55, %v2478_v21 }
 0x1f9   : > { %3090 = vst [vmem:[%s5866_s19 + $0xe0] sm:$0xff] %v3058_v50  ;;  %v3061_v29 = vadd.f32 %v5858_v31, %v3022_v17  ;;  %v3021_v53 = vadd.f32 %v2982_v9, %v2750_v59 }
 0x1fb   : > { %3093 = vst [vmem:[%s5866_s19 + $0xf8] sm:$0xff] %v3061_v29  ;;  %v3060_v2 = vadd.f32 %v5858_v31, %v3021_v53 }
 0x1fd   : > { %3092 = vst [vmem:[%s5866_s19 + $0xf0] sm:$0xff] %v3060_v2 }
 0x1fe PF: > { %s13_s14 = sadd.s32 1, %s4314_s14   ;;  %s6316_s12 = smov %s4310_s13 }
 0x1ff   : > { %p10_p5 = scmp.ge.s32.totalorder %s13_s14, 4   ;;  %s6317_s13 = smov %s6319_s15 }
 0x201   :  { %12 = sbr.rel (!%p10_p5) target bundleno = 2 (0x2), region = 76 }

</bundles_post_ra>
